<compile_context>
chip_gen: v7x
topology: tpu7x:2x2x1
jax: 0.10.0
libtpu: 0.0.40
codegen_flags: <defaults>
</compile_context>

<pallas_src>
import jax
import jax.numpy as jnp
from jax.experimental import pallas as pl
from jax.experimental.pallas import tpu as pltpu


def lstm_decoder_kernel(x_ref, w1_ref, b1_ref, wih_ref, whh_ref, bg_ref,
                        w2_ref, b2_ref, out_ref, seq_ref, xproj_ref):
    """Whole decoder forward, fully VMEM-resident.

    x_ref    : (B, LATENT)
    w1_ref   : (LATENT, G),  b1_ref : (1, G)          G = 4H, cols/lanes [H,G) zero
    wih_ref  : (L, G, G),    whh_ref: (L, G, G)       rows [H,G) zero
    bg_ref   : (L, 1, G)     combined b_ih + b_hh
    w2_ref   : (G, Ipad),    b2_ref : (1, Ipad)       rows [H,G) zero, cols [I,Ipad) zero
    out_ref  : (T*B, Ipad)   time-major rows (t*B + b), lane-dense
    seq_ref  : VMEM (T*B, G) current layer's full-width hidden sequence
    xproj_ref: VMEM (T*B, G) current layer's bulk input projection (l > 0)
    """
    B = x_ref.shape[0]
    G = w1_ref.shape[1]            # 4H (padded, lane-aligned)
    H = G // 4
    L = wih_ref.shape[0]
    TB = seq_ref.shape[0]
    T = TB // B

    # mlp1 on the latent: identical for every timestep -> compute once.
    # Result is (B, G) with lanes [H, G) exactly zero (padded w1/b1 columns).
    inp = (jnp.dot(x_ref[...], w1_ref[...], preferred_element_type=jnp.float32)
           + b1_ref[...])

    for l in range(L):                                   # static unroll (L small)
        bias = bg_ref[l]                                 # (1, G)

        # Input projection for the whole layer, OFF the serial recurrence.
        if l == 0:
            # Constant across time: one (B,G)x(G,G) dot reused every step.
            x_proj0 = (jnp.dot(inp, wih_ref[l], preferred_element_type=jnp.float32)
                       + bias)                           # (B, G)
        else:
            # Whole previous-layer sequence in one (T*B,G)x(G,G) dot, spilled to
            # VMEM so per-step loads are static-offset vld off the h->h chain.
            xproj_ref[...] = (jnp.dot(seq_ref[...], wih_ref[l],
                                      preferred_element_type=jnp.float32) + bias)

        whh = whh_ref[l]                                 # (G, G), rows [H,G) = 0

        h_full = jnp.zeros((B, G), jnp.float32)          # lanes [H,G) junk-but-harmless
        c = jnp.zeros((B, G), jnp.float32)

        for t in range(T):                               # static unroll (T small)
            xp = x_proj0 if l == 0 else xproj_ref[t * B:(t + 1) * B, :]
            # Zero rows [H,G) of whh kill the junk lanes of h_full -> gates exact.
            gates = xp + jnp.dot(h_full, whh, preferred_element_type=jnp.float32)

            # Full-vreg activations (EUP); lane order i|f|g|o. Alignment via XLU rolls.
            sig = jax.nn.sigmoid(gates)                  # sigmoid of all gates
            tg = jnp.tanh(gates)                         # tanh of all gates
            f_al = pltpu.roll(sig, shift=3 * H, axis=1)  # f -> lanes [0, H)
            g_al = pltpu.roll(tg, shift=2 * H, axis=1)   # g -> lanes [0, H)
            o_al = pltpu.roll(sig, shift=1 * H, axis=1)  # o -> lanes [0, H)

            c = f_al * c + sig * g_al                    # valid on lanes [0, H)
            h_full = o_al * jnp.tanh(c)                  # valid on lanes [0, H)

            # Lane-dense 128-wide store (no masked vst.msk).
            seq_ref[t * B:(t + 1) * B, :] = h_full

        # seq_ref now holds layer l's hidden sequence -> input of layer l+1.

    # mlp2: one bulk matmul + one lane-dense store; padded rows/cols of w2 keep
    # junk lanes of h_full out of the result.
    out_ref[...] = (jnp.dot(seq_ref[...], w2_ref[...],
                            preferred_element_type=jnp.float32)
                    + b2_ref[...]).astype(out_ref.dtype)


def _pad_params(params, hidden_size, out_lanes):
    """Zero-pad weights to full lane width (G = 4H) / lane-dense output."""
    w1, b1, wih, whh, bih, bhh, w2, b2 = params
    H = hidden_size
    G = 4 * H
    L = wih.shape[0]
    latent = w1.shape[0]
    I = w2.shape[1]

    w1_p = jnp.zeros((latent, G), jnp.float32).at[:, :H].set(w1)
    b1_p = jnp.zeros((1, G), jnp.float32).at[:, :H].set(b1)
    wih_p = jnp.zeros((L, G, G), jnp.float32).at[:, :H, :].set(wih)
    whh_p = jnp.zeros((L, G, G), jnp.float32).at[:, :H, :].set(whh)
    bg = bih + bhh                                        # (L, 1, G)
    w2_p = jnp.zeros((G, out_lanes), jnp.float32).at[:H, :I].set(w2)
    b2_p = jnp.zeros((1, out_lanes), jnp.float32).at[:, :I].set(b2)
    return w1_p, b1_p, wih_p, whh_p, bg, w2_p, b2_p


def lstm_decoder_forward(x, params, sequence_length):
    w1 = params[0]
    w2 = params[6]
    B = x.shape[0]
    H = w1.shape[1]
    I = w2.shape[1]
    T = sequence_length
    G = 4 * H
    Ipad = ((I + 127) // 128) * 128                       # lane-dense output width

    w1_p, b1_p, wih_p, whh_p, bg, w2_p, b2_p = _pad_params(params, H, Ipad)

    out_flat = pl.pallas_call(
        lstm_decoder_kernel,
        out_shape=jax.ShapeDtypeStruct((T * B, Ipad), jnp.float32),
        in_specs=[pl.BlockSpec(memory_space=pltpu.MemorySpace.VMEM)] * 8,
        out_specs=pl.BlockSpec(memory_space=pltpu.MemorySpace.VMEM),
        scratch_shapes=[pltpu.VMEM((T * B, G), jnp.float32),   # hidden sequence
                        pltpu.VMEM((T * B, G), jnp.float32)],  # bulk input projection
    )(x, w1_p, b1_p, wih_p, whh_p, bg, w2_p, b2_p)

    # (T*B, Ipad) time-major -> PyTorch batch_first (B, T, I)
    return jnp.transpose(out_flat[:, :I].reshape(T, B, I), (1, 0, 2))


def reference_forward(x, params, sequence_length):
    """Pure-JAX reference matching PyTorch LSTMDecoder semantics."""
    w1, b1, wih, whh, bih, bhh, w2, b2 = params
    B = x.shape[0]
    H = w1.shape[1]
    L = wih.shape[0]
    T = sequence_length

    inp = x @ w1 + b1[0]                                  # (B, H)
    seq = jnp.broadcast_to(inp[:, None, :], (B, T, H))    # repeated latent path
    for l in range(L):
        h = jnp.zeros((B, H), jnp.float32)
        c = jnp.zeros((B, H), jnp.float32)
        outs = []
        for t in range(T):
            xt = seq[:, t, :]
            gates = xt @ wih[l] + h @ whh[l] + bih[l, 0] + bhh[l, 0]
            i_g = jax.nn.sigmoid(gates[:, 0 * H:1 * H])
            f_g = jax.nn.sigmoid(gates[:, 1 * H:2 * H])
            g_g = jnp.tanh(gates[:, 2 * H:3 * H])
            o_g = jax.nn.sigmoid(gates[:, 3 * H:4 * H])
            c = f_g * c + i_g * g_g
            h = o_g * jnp.tanh(c)
            outs.append(h)
        seq = jnp.stack(outs, axis=1)
    return seq @ w2 + b2[0]


def init_params(key, latent_size, hidden_size, input_size, num_layers):
    ks = jax.random.split(key, 8)
    H, Lz, I, L = hidden_size, latent_size, input_size, num_layers
    scale = 0.1
    w1 = scale * jax.random.normal(ks[0], (Lz, H), jnp.float32)
    b1 = scale * jax.random.normal(ks[1], (1, H), jnp.float32)
    wih = scale * jax.random.normal(ks[2], (L, H, 4 * H), jnp.float32)
    whh = scale * jax.random.normal(ks[3], (L, H, 4 * H), jnp.float32)
    bih = scale * jax.random.normal(ks[4], (L, 1, 4 * H), jnp.float32)
    bhh = scale * jax.random.normal(ks[5], (L, 1, 4 * H), jnp.float32)
    w2 = scale * jax.random.normal(ks[6], (H, I), jnp.float32)
    b2 = scale * jax.random.normal(ks[7], (1, I), jnp.float32)
    return (w1, b1, wih, whh, bih, bhh, w2, b2)


if __name__ == "__main__":
    # Small shapes consistent with LSTMDecoder(seq_len=8, latent=16, hidden=32, input=4, layers=2)
    SEQ_LEN = 8
    LATENT = 16
    HIDDEN = 32
    INPUT_SIZE = 4
    NUM_LAYERS = 2
    BATCH = 2

    key = jax.random.PRNGKey(0)
    k_x, k_p = jax.random.split(key)
    x = jax.random.normal(k_x, (BATCH, LATENT), jnp.float32)
    params = init_params(k_p, LATENT, HIDDEN, INPUT_SIZE, NUM_LAYERS)

    out = lstm_decoder_forward(x, params, SEQ_LEN)
    out = jax.block_until_ready(out)

    ref = reference_forward(x, params, SEQ_LEN)
    assert out.shape == (BATCH, SEQ_LEN, INPUT_SIZE), out.shape
    assert jnp.allclose(out, ref, atol=1e-5, rtol=1e-5), float(jnp.max(jnp.abs(out - ref)))

    print("KERNEL_OK")
</pallas_src>

<mosaic_0001>
module attributes {stable_mosaic.version = 11 : i64} {
  func.func @lstm_decoder_kernel(%arg0: memref<2x16xf32, #tpu.memory_space<vmem>>, %arg1: memref<16x128xf32, #tpu.memory_space<vmem>>, %arg2: memref<1x128xf32, #tpu.memory_space<vmem>>, %arg3: memref<2x128x128xf32, #tpu.memory_space<vmem>>, %arg4: memref<2x128x128xf32, #tpu.memory_space<vmem>>, %arg5: memref<2x1x128xf32, #tpu.memory_space<vmem>>, %arg6: memref<128x128xf32, #tpu.memory_space<vmem>>, %arg7: memref<1x128xf32, #tpu.memory_space<vmem>>, %arg8: memref<16x128xf32, #tpu.memory_space<vmem>>, %arg9: memref<16x128xf32, #tpu.memory_space<vmem>>, %arg10: memref<16x128xf32, #tpu.memory_space<vmem>>) attributes {dimension_semantics = [], scalar_prefetch = 0 : i64, scratch_operands = 2 : i64, tpu.core_type = #tpu.core_type<tc>} {
    %c0 = arith.constant 0 : index
    %c0_0 = arith.constant 0 : index
    %0 = vector.load %arg0[%c0, %c0_0] : memref<2x16xf32, #tpu.memory_space<vmem>>, vector<2x16xf32>
    %c0_1 = arith.constant 0 : index
    %c0_2 = arith.constant 0 : index
    %1 = vector.load %arg1[%c0_1, %c0_2] : memref<16x128xf32, #tpu.memory_space<vmem>>, vector<16x128xf32>
    %cst = arith.constant dense<0.000000e+00> : vector<2x128xf32>
    %2 = tpu.matmul %0, %1, %cst {dimension_numbers = #tpu.dot_dimension_numbers<[1], [0], [0], [1], [0, 0, 1, 1], [], []>} : vector<2x16xf32>, vector<16x128xf32>, vector<2x128xf32> -> vector<2x128xf32>
    %c0_3 = arith.constant 0 : index
    %c0_4 = arith.constant 0 : index
    %3 = vector.load %arg2[%c0_3, %c0_4] : memref<1x128xf32, #tpu.memory_space<vmem>>, vector<1x128xf32>
    %4 = vector.broadcast %3 : vector<1x128xf32> to vector<2x128xf32>
    %5 = arith.addf %2, %4 : vector<2x128xf32>
    %c0_5 = arith.constant 0 : index
    %c0_6 = arith.constant 0 : index
    %c0_7 = arith.constant 0 : index
    %6 = vector.load %arg5[%c0_5, %c0_6, %c0_7] : memref<2x1x128xf32, #tpu.memory_space<vmem>>, vector<1x1x128xf32>
    %7 = vector.shape_cast %6 : vector<1x1x128xf32> to vector<1x128xf32>
    %c0_8 = arith.constant 0 : index
    %c0_9 = arith.constant 0 : index
    %c0_10 = arith.constant 0 : index
    %8 = vector.load %arg3[%c0_8, %c0_9, %c0_10] : memref<2x128x128xf32, #tpu.memory_space<vmem>>, vector<1x128x128xf32>
    %9 = vector.shape_cast %8 : vector<1x128x128xf32> to vector<128x128xf32>
    %cst_11 = arith.constant dense<0.000000e+00> : vector<2x128xf32>
    %10 = tpu.matmul %5, %9, %cst_11 {dimension_numbers = #tpu.dot_dimension_numbers<[1], [0], [0], [1], [0, 0, 1, 1], [], []>} : vector<2x128xf32>, vector<128x128xf32>, vector<2x128xf32> -> vector<2x128xf32>
    %11 = vector.broadcast %7 : vector<1x128xf32> to vector<2x128xf32>
    %12 = arith.addf %10, %11 : vector<2x128xf32>
    %c0_12 = arith.constant 0 : index
    %c0_13 = arith.constant 0 : index
    %c0_14 = arith.constant 0 : index
    %13 = vector.load %arg4[%c0_12, %c0_13, %c0_14] : memref<2x128x128xf32, #tpu.memory_space<vmem>>, vector<1x128x128xf32>
    %14 = vector.shape_cast %13 : vector<1x128x128xf32> to vector<128x128xf32>
    %cst_15 = arith.constant 0.000000e+00 : f32
    %15 = vector.broadcast %cst_15 : f32 to vector<2x128xf32>
    %cst_16 = arith.constant 0.000000e+00 : f32
    %16 = vector.broadcast %cst_16 : f32 to vector<2x128xf32>
    %cst_17 = arith.constant dense<0.000000e+00> : vector<2x128xf32>
    %17 = tpu.matmul %15, %14, %cst_17 {dimension_numbers = #tpu.dot_dimension_numbers<[1], [0], [0], [1], [0, 0, 1, 1], [], []>} : vector<2x128xf32>, vector<128x128xf32>, vector<2x128xf32> -> vector<2x128xf32>
    %18 = arith.addf %12, %17 : vector<2x128xf32>
    %19 = arith.negf %18 : vector<2x128xf32>
    %20 = math.exp %19 : vector<2x128xf32>
    %cst_18 = arith.constant 1.000000e+00 : f32
    %21 = vector.broadcast %cst_18 : f32 to vector<2x128xf32>
    %22 = arith.addf %21, %20 : vector<2x128xf32>
    %23 = arith.divf %21, %22 : vector<2x128xf32>
    %24 = math.tanh %18 : vector<2x128xf32>
    %c96_i32 = arith.constant 96 : i32
    %25 = tpu.dynamic_rotate %23 by %c96_i32 dim 1 : vector<2x128xf32>, i32 -> vector<2x128xf32>
    %c64_i32 = arith.constant 64 : i32
    %26 = tpu.dynamic_rotate %24 by %c64_i32 dim 1 : vector<2x128xf32>, i32 -> vector<2x128xf32>
    %c32_i32 = arith.constant 32 : i32
    %27 = tpu.dynamic_rotate %23 by %c32_i32 dim 1 : vector<2x128xf32>, i32 -> vector<2x128xf32>
    %28 = arith.mulf %25, %16 : vector<2x128xf32>
    %29 = arith.mulf %23, %26 : vector<2x128xf32>
    %30 = arith.addf %28, %29 : vector<2x128xf32>
    %31 = math.tanh %30 : vector<2x128xf32>
    %32 = arith.mulf %27, %31 : vector<2x128xf32>
    %c0_19 = arith.constant 0 : index
    %c0_20 = arith.constant 0 : index
    %33 = vector.load %arg9[%c0_19, %c0_20] : memref<16x128xf32, #tpu.memory_space<vmem>>, vector<2x128xf32>
    tpu.vector_store %arg9[%c0_19, %c0_20], %32 {strides = array<i32>} : memref<16x128xf32, #tpu.memory_space<vmem>>, vector<2x128xf32>,
    %cst_21 = arith.constant dense<0.000000e+00> : vector<2x128xf32>
    %34 = tpu.matmul %32, %14, %cst_21 {dimension_numbers = #tpu.dot_dimension_numbers<[1], [0], [0], [1], [0, 0, 1, 1], [], []>} : vector<2x128xf32>, vector<128x128xf32>, vector<2x128xf32> -> vector<2x128xf32>
    %35 = arith.addf %12, %34 : vector<2x128xf32>
    %36 = arith.negf %35 : vector<2x128xf32>
    %37 = math.exp %36 : vector<2x128xf32>
    %cst_22 = arith.constant 1.000000e+00 : f32
    %38 = vector.broadcast %cst_22 : f32 to vector<2x128xf32>
    %39 = arith.addf %38, %37 : vector<2x128xf32>
    %40 = arith.divf %38, %39 : vector<2x128xf32>
    %41 = math.tanh %35 : vector<2x128xf32>
    %c96_i32_23 = arith.constant 96 : i32
    %42 = tpu.dynamic_rotate %40 by %c96_i32_23 dim 1 : vector<2x128xf32>, i32 -> vector<2x128xf32>
    %c64_i32_24 = arith.constant 64 : i32
    %43 = tpu.dynamic_rotate %41 by %c64_i32_24 dim 1 : vector<2x128xf32>, i32 -> vector<2x128xf32>
    %c32_i32_25 = arith.constant 32 : i32
    %44 = tpu.dynamic_rotate %40 by %c32_i32_25 dim 1 : vector<2x128xf32>, i32 -> vector<2x128xf32>
    %45 = arith.mulf %42, %30 : vector<2x128xf32>
    %46 = arith.mulf %40, %43 : vector<2x128xf32>
    %47 = arith.addf %45, %46 : vector<2x128xf32>
    %48 = math.tanh %47 : vector<2x128xf32>
    %49 = arith.mulf %44, %48 : vector<2x128xf32>
    %c2 = arith.constant 2 : index
    %c0_26 = arith.constant 0 : index
    %50 = vector.load %arg9[%c2, %c0_26] : memref<16x128xf32, #tpu.memory_space<vmem>>, vector<2x128xf32>
    tpu.vector_store %arg9[%c2, %c0_26], %49 {strides = array<i32>} : memref<16x128xf32, #tpu.memory_space<vmem>>, vector<2x128xf32>,
    %cst_27 = arith.constant dense<0.000000e+00> : vector<2x128xf32>
    %51 = tpu.matmul %49, %14, %cst_27 {dimension_numbers = #tpu.dot_dimension_numbers<[1], [0], [0], [1], [0, 0, 1, 1], [], []>} : vector<2x128xf32>, vector<128x128xf32>, vector<2x128xf32> -> vector<2x128xf32>
    %52 = arith.addf %12, %51 : vector<2x128xf32>
    %53 = arith.negf %52 : vector<2x128xf32>
    %54 = math.exp %53 : vector<2x128xf32>
    %cst_28 = arith.constant 1.000000e+00 : f32
    %55 = vector.broadcast %cst_28 : f32 to vector<2x128xf32>
    %56 = arith.addf %55, %54 : vector<2x128xf32>
    %57 = arith.divf %55, %56 : vector<2x128xf32>
    %58 = math.tanh %52 : vector<2x128xf32>
    %c96_i32_29 = arith.constant 96 : i32
    %59 = tpu.dynamic_rotate %57 by %c96_i32_29 dim 1 : vector<2x128xf32>, i32 -> vector<2x128xf32>
    %c64_i32_30 = arith.constant 64 : i32
    %60 = tpu.dynamic_rotate %58 by %c64_i32_30 dim 1 : vector<2x128xf32>, i32 -> vector<2x128xf32>
    %c32_i32_31 = arith.constant 32 : i32
    %61 = tpu.dynamic_rotate %57 by %c32_i32_31 dim 1 : vector<2x128xf32>, i32 -> vector<2x128xf32>
    %62 = arith.mulf %59, %47 : vector<2x128xf32>
    %63 = arith.mulf %57, %60 : vector<2x128xf32>
    %64 = arith.addf %62, %63 : vector<2x128xf32>
    %65 = math.tanh %64 : vector<2x128xf32>
    %66 = arith.mulf %61, %65 : vector<2x128xf32>
    %c4 = arith.constant 4 : index
    %c0_32 = arith.constant 0 : index
    %67 = vector.load %arg9[%c4, %c0_32] : memref<16x128xf32, #tpu.memory_space<vmem>>, vector<2x128xf32>
    tpu.vector_store %arg9[%c4, %c0_32], %66 {strides = array<i32>} : memref<16x128xf32, #tpu.memory_space<vmem>>, vector<2x128xf32>,
    %cst_33 = arith.constant dense<0.000000e+00> : vector<2x128xf32>
    %68 = tpu.matmul %66, %14, %cst_33 {dimension_numbers = #tpu.dot_dimension_numbers<[1], [0], [0], [1], [0, 0, 1, 1], [], []>} : vector<2x128xf32>, vector<128x128xf32>, vector<2x128xf32> -> vector<2x128xf32>
    %69 = arith.addf %12, %68 : vector<2x128xf32>
    %70 = arith.negf %69 : vector<2x128xf32>
    %71 = math.exp %70 : vector<2x128xf32>
    %cst_34 = arith.constant 1.000000e+00 : f32
    %72 = vector.broadcast %cst_34 : f32 to vector<2x128xf32>
    %73 = arith.addf %72, %71 : vector<2x128xf32>
    %74 = arith.divf %72, %73 : vector<2x128xf32>
    %75 = math.tanh %69 : vector<2x128xf32>
    %c96_i32_35 = arith.constant 96 : i32
    %76 = tpu.dynamic_rotate %74 by %c96_i32_35 dim 1 : vector<2x128xf32>, i32 -> vector<2x128xf32>
    %c64_i32_36 = arith.constant 64 : i32
    %77 = tpu.dynamic_rotate %75 by %c64_i32_36 dim 1 : vector<2x128xf32>, i32 -> vector<2x128xf32>
    %c32_i32_37 = arith.constant 32 : i32
    %78 = tpu.dynamic_rotate %74 by %c32_i32_37 dim 1 : vector<2x128xf32>, i32 -> vector<2x128xf32>
    %79 = arith.mulf %76, %64 : vector<2x128xf32>
    %80 = arith.mulf %74, %77 : vector<2x128xf32>
    %81 = arith.addf %79, %80 : vector<2x128xf32>
    %82 = math.tanh %81 : vector<2x128xf32>
    %83 = arith.mulf %78, %82 : vector<2x128xf32>
    %c6 = arith.constant 6 : index
    %c0_38 = arith.constant 0 : index
    %84 = vector.load %arg9[%c6, %c0_38] : memref<16x128xf32, #tpu.memory_space<vmem>>, vector<2x128xf32>
    tpu.vector_store %arg9[%c6, %c0_38], %83 {strides = array<i32>} : memref<16x128xf32, #tpu.memory_space<vmem>>, vector<2x128xf32>,
    %cst_39 = arith.constant dense<0.000000e+00> : vector<2x128xf32>
    %85 = tpu.matmul %83, %14, %cst_39 {dimension_numbers = #tpu.dot_dimension_numbers<[1], [0], [0], [1], [0, 0, 1, 1], [], []>} : vector<2x128xf32>, vector<128x128xf32>, vector<2x128xf32> -> vector<2x128xf32>
    %86 = arith.addf %12, %85 : vector<2x128xf32>
    %87 = arith.negf %86 : vector<2x128xf32>
    %88 = math.exp %87 : vector<2x128xf32>
    %cst_40 = arith.constant 1.000000e+00 : f32
    %89 = vector.broadcast %cst_40 : f32 to vector<2x128xf32>
    %90 = arith.addf %89, %88 : vector<2x128xf32>
    %91 = arith.divf %89, %90 : vector<2x128xf32>
    %92 = math.tanh %86 : vector<2x128xf32>
    %c96_i32_41 = arith.constant 96 : i32
    %93 = tpu.dynamic_rotate %91 by %c96_i32_41 dim 1 : vector<2x128xf32>, i32 -> vector<2x128xf32>
    %c64_i32_42 = arith.constant 64 : i32
    %94 = tpu.dynamic_rotate %92 by %c64_i32_42 dim 1 : vector<2x128xf32>, i32 -> vector<2x128xf32>
    %c32_i32_43 = arith.constant 32 : i32
    %95 = tpu.dynamic_rotate %91 by %c32_i32_43 dim 1 : vector<2x128xf32>, i32 -> vector<2x128xf32>
    %96 = arith.mulf %93, %81 : vector<2x128xf32>
    %97 = arith.mulf %91, %94 : vector<2x128xf32>
    %98 = arith.addf %96, %97 : vector<2x128xf32>
    %99 = math.tanh %98 : vector<2x128xf32>
    %100 = arith.mulf %95, %99 : vector<2x128xf32>
    %c8 = arith.constant 8 : index
    %c0_44 = arith.constant 0 : index
    %101 = vector.load %arg9[%c8, %c0_44] : memref<16x128xf32, #tpu.memory_space<vmem>>, vector<2x128xf32>
    tpu.vector_store %arg9[%c8, %c0_44], %100 {strides = array<i32>} : memref<16x128xf32, #tpu.memory_space<vmem>>, vector<2x128xf32>,
    %cst_45 = arith.constant dense<0.000000e+00> : vector<2x128xf32>
    %102 = tpu.matmul %100, %14, %cst_45 {dimension_numbers = #tpu.dot_dimension_numbers<[1], [0], [0], [1], [0, 0, 1, 1], [], []>} : vector<2x128xf32>, vector<128x128xf32>, vector<2x128xf32> -> vector<2x128xf32>
    %103 = arith.addf %12, %102 : vector<2x128xf32>
    %104 = arith.negf %103 : vector<2x128xf32>
    %105 = math.exp %104 : vector<2x128xf32>
    %cst_46 = arith.constant 1.000000e+00 : f32
    %106 = vector.broadcast %cst_46 : f32 to vector<2x128xf32>
    %107 = arith.addf %106, %105 : vector<2x128xf32>
    %108 = arith.divf %106, %107 : vector<2x128xf32>
    %109 = math.tanh %103 : vector<2x128xf32>
    %c96_i32_47 = arith.constant 96 : i32
    %110 = tpu.dynamic_rotate %108 by %c96_i32_47 dim 1 : vector<2x128xf32>, i32 -> vector<2x128xf32>
    %c64_i32_48 = arith.constant 64 : i32
    %111 = tpu.dynamic_rotate %109 by %c64_i32_48 dim 1 : vector<2x128xf32>, i32 -> vector<2x128xf32>
    %c32_i32_49 = arith.constant 32 : i32
    %112 = tpu.dynamic_rotate %108 by %c32_i32_49 dim 1 : vector<2x128xf32>, i32 -> vector<2x128xf32>
    %113 = arith.mulf %110, %98 : vector<2x128xf32>
    %114 = arith.mulf %108, %111 : vector<2x128xf32>
    %115 = arith.addf %113, %114 : vector<2x128xf32>
    %116 = math.tanh %115 : vector<2x128xf32>
    %117 = arith.mulf %112, %116 : vector<2x128xf32>
    %c10 = arith.constant 10 : index
    %c0_50 = arith.constant 0 : index
    %118 = vector.load %arg9[%c10, %c0_50] : memref<16x128xf32, #tpu.memory_space<vmem>>, vector<2x128xf32>
    tpu.vector_store %arg9[%c10, %c0_50], %117 {strides = array<i32>} : memref<16x128xf32, #tpu.memory_space<vmem>>, vector<2x128xf32>,
    %cst_51 = arith.constant dense<0.000000e+00> : vector<2x128xf32>
    %119 = tpu.matmul %117, %14, %cst_51 {dimension_numbers = #tpu.dot_dimension_numbers<[1], [0], [0], [1], [0, 0, 1, 1], [], []>} : vector<2x128xf32>, vector<128x128xf32>, vector<2x128xf32> -> vector<2x128xf32>
    %120 = arith.addf %12, %119 : vector<2x128xf32>
    %121 = arith.negf %120 : vector<2x128xf32>
    %122 = math.exp %121 : vector<2x128xf32>
    %cst_52 = arith.constant 1.000000e+00 : f32
    %123 = vector.broadcast %cst_52 : f32 to vector<2x128xf32>
    %124 = arith.addf %123, %122 : vector<2x128xf32>
    %125 = arith.divf %123, %124 : vector<2x128xf32>
    %126 = math.tanh %120 : vector<2x128xf32>
    %c96_i32_53 = arith.constant 96 : i32
    %127 = tpu.dynamic_rotate %125 by %c96_i32_53 dim 1 : vector<2x128xf32>, i32 -> vector<2x128xf32>
    %c64_i32_54 = arith.constant 64 : i32
    %128 = tpu.dynamic_rotate %126 by %c64_i32_54 dim 1 : vector<2x128xf32>, i32 -> vector<2x128xf32>
    %c32_i32_55 = arith.constant 32 : i32
    %129 = tpu.dynamic_rotate %125 by %c32_i32_55 dim 1 : vector<2x128xf32>, i32 -> vector<2x128xf32>
    %130 = arith.mulf %127, %115 : vector<2x128xf32>
    %131 = arith.mulf %125, %128 : vector<2x128xf32>
    %132 = arith.addf %130, %131 : vector<2x128xf32>
    %133 = math.tanh %132 : vector<2x128xf32>
    %134 = arith.mulf %129, %133 : vector<2x128xf32>
    %c12 = arith.constant 12 : index
    %c0_56 = arith.constant 0 : index
    %135 = vector.load %arg9[%c12, %c0_56] : memref<16x128xf32, #tpu.memory_space<vmem>>, vector<2x128xf32>
    tpu.vector_store %arg9[%c12, %c0_56], %134 {strides = array<i32>} : memref<16x128xf32, #tpu.memory_space<vmem>>, vector<2x128xf32>,
    %cst_57 = arith.constant dense<0.000000e+00> : vector<2x128xf32>
    %136 = tpu.matmul %134, %14, %cst_57 {dimension_numbers = #tpu.dot_dimension_numbers<[1], [0], [0], [1], [0, 0, 1, 1], [], []>} : vector<2x128xf32>, vector<128x128xf32>, vector<2x128xf32> -> vector<2x128xf32>
    %137 = arith.addf %12, %136 : vector<2x128xf32>
    %138 = arith.negf %137 : vector<2x128xf32>
    %139 = math.exp %138 : vector<2x128xf32>
    %cst_58 = arith.constant 1.000000e+00 : f32
    %140 = vector.broadcast %cst_58 : f32 to vector<2x128xf32>
    %141 = arith.addf %140, %139 : vector<2x128xf32>
    %142 = arith.divf %140, %141 : vector<2x128xf32>
    %143 = math.tanh %137 : vector<2x128xf32>
    %c96_i32_59 = arith.constant 96 : i32
    %144 = tpu.dynamic_rotate %142 by %c96_i32_59 dim 1 : vector<2x128xf32>, i32 -> vector<2x128xf32>
    %c64_i32_60 = arith.constant 64 : i32
    %145 = tpu.dynamic_rotate %143 by %c64_i32_60 dim 1 : vector<2x128xf32>, i32 -> vector<2x128xf32>
    %c32_i32_61 = arith.constant 32 : i32
    %146 = tpu.dynamic_rotate %142 by %c32_i32_61 dim 1 : vector<2x128xf32>, i32 -> vector<2x128xf32>
    %147 = arith.mulf %144, %132 : vector<2x128xf32>
    %148 = arith.mulf %142, %145 : vector<2x128xf32>
    %149 = arith.addf %147, %148 : vector<2x128xf32>
    %150 = math.tanh %149 : vector<2x128xf32>
    %151 = arith.mulf %146, %150 : vector<2x128xf32>
    %c14 = arith.constant 14 : index
    %c0_62 = arith.constant 0 : index
    %152 = vector.load %arg9[%c14, %c0_62] : memref<16x128xf32, #tpu.memory_space<vmem>>, vector<2x128xf32>
    tpu.vector_store %arg9[%c14, %c0_62], %151 {strides = array<i32>} : memref<16x128xf32, #tpu.memory_space<vmem>>, vector<2x128xf32>,
    %c1 = arith.constant 1 : index
    %c0_63 = arith.constant 0 : index
    %c0_64 = arith.constant 0 : index
    %153 = vector.load %arg5[%c1, %c0_63, %c0_64] : memref<2x1x128xf32, #tpu.memory_space<vmem>>, vector<1x1x128xf32>
    %154 = vector.shape_cast %153 : vector<1x1x128xf32> to vector<1x128xf32>
    %c0_65 = arith.constant 0 : index
    %c0_66 = arith.constant 0 : index
    %155 = vector.load %arg9[%c0_65, %c0_66] : memref<16x128xf32, #tpu.memory_space<vmem>>, vector<16x128xf32>
    %c1_67 = arith.constant 1 : index
    %c0_68 = arith.constant 0 : index
    %c0_69 = arith.constant 0 : index
    %156 = vector.load %arg3[%c1_67, %c0_68, %c0_69] : memref<2x128x128xf32, #tpu.memory_space<vmem>>, vector<1x128x128xf32>
    %157 = vector.shape_cast %156 : vector<1x128x128xf32> to vector<128x128xf32>
    %cst_70 = arith.constant dense<0.000000e+00> : vector<16x128xf32>
    %158 = tpu.matmul %155, %157, %cst_70 {dimension_numbers = #tpu.dot_dimension_numbers<[1], [0], [0], [1], [0, 0, 1, 1], [], []>} : vector<16x128xf32>, vector<128x128xf32>, vector<16x128xf32> -> vector<16x128xf32>
    %159 = vector.broadcast %154 : vector<1x128xf32> to vector<16x128xf32>
    %160 = arith.addf %158, %159 : vector<16x128xf32>
    %c0_71 = arith.constant 0 : index
    %c0_72 = arith.constant 0 : index
    %161 = vector.load %arg10[%c0_71, %c0_72] : memref<16x128xf32, #tpu.memory_space<vmem>>, vector<16x128xf32>
    tpu.vector_store %arg10[%c0_71, %c0_72], %160 {strides = array<i32>} : memref<16x128xf32, #tpu.memory_space<vmem>>, vector<16x128xf32>,
    %c1_73 = arith.constant 1 : index
    %c0_74 = arith.constant 0 : index
    %c0_75 = arith.constant 0 : index
    %162 = vector.load %arg4[%c1_73, %c0_74, %c0_75] : memref<2x128x128xf32, #tpu.memory_space<vmem>>, vector<1x128x128xf32>
    %163 = vector.shape_cast %162 : vector<1x128x128xf32> to vector<128x128xf32>
    %cst_76 = arith.constant 0.000000e+00 : f32
    %164 = vector.broadcast %cst_76 : f32 to vector<2x128xf32>
    %cst_77 = arith.constant 0.000000e+00 : f32
    %165 = vector.broadcast %cst_77 : f32 to vector<2x128xf32>
    %c0_78 = arith.constant 0 : index
    %c0_79 = arith.constant 0 : index
    %166 = vector.load %arg10[%c0_78, %c0_79] : memref<16x128xf32, #tpu.memory_space<vmem>>, vector<2x128xf32>
    %cst_80 = arith.constant dense<0.000000e+00> : vector<2x128xf32>
    %167 = tpu.matmul %164, %163, %cst_80 {dimension_numbers = #tpu.dot_dimension_numbers<[1], [0], [0], [1], [0, 0, 1, 1], [], []>} : vector<2x128xf32>, vector<128x128xf32>, vector<2x128xf32> -> vector<2x128xf32>
    %168 = arith.addf %166, %167 : vector<2x128xf32>
    %169 = arith.negf %168 : vector<2x128xf32>
    %170 = math.exp %169 : vector<2x128xf32>
    %cst_81 = arith.constant 1.000000e+00 : f32
    %171 = vector.broadcast %cst_81 : f32 to vector<2x128xf32>
    %172 = arith.addf %171, %170 : vector<2x128xf32>
    %173 = arith.divf %171, %172 : vector<2x128xf32>
    %174 = math.tanh %168 : vector<2x128xf32>
    %c96_i32_82 = arith.constant 96 : i32
    %175 = tpu.dynamic_rotate %173 by %c96_i32_82 dim 1 : vector<2x128xf32>, i32 -> vector<2x128xf32>
    %c64_i32_83 = arith.constant 64 : i32
    %176 = tpu.dynamic_rotate %174 by %c64_i32_83 dim 1 : vector<2x128xf32>, i32 -> vector<2x128xf32>
    %c32_i32_84 = arith.constant 32 : i32
    %177 = tpu.dynamic_rotate %173 by %c32_i32_84 dim 1 : vector<2x128xf32>, i32 -> vector<2x128xf32>
    %178 = arith.mulf %175, %165 : vector<2x128xf32>
    %179 = arith.mulf %173, %176 : vector<2x128xf32>
    %180 = arith.addf %178, %179 : vector<2x128xf32>
    %181 = math.tanh %180 : vector<2x128xf32>
    %182 = arith.mulf %177, %181 : vector<2x128xf32>
    %c0_85 = arith.constant 0 : index
    %c0_86 = arith.constant 0 : index
    %183 = vector.load %arg9[%c0_85, %c0_86] : memref<16x128xf32, #tpu.memory_space<vmem>>, vector<2x128xf32>
    tpu.vector_store %arg9[%c0_85, %c0_86], %182 {strides = array<i32>} : memref<16x128xf32, #tpu.memory_space<vmem>>, vector<2x128xf32>,
    %c2_87 = arith.constant 2 : index
    %c0_88 = arith.constant 0 : index
    %184 = vector.load %arg10[%c2_87, %c0_88] : memref<16x128xf32, #tpu.memory_space<vmem>>, vector<2x128xf32>
    %cst_89 = arith.constant dense<0.000000e+00> : vector<2x128xf32>
    %185 = tpu.matmul %182, %163, %cst_89 {dimension_numbers = #tpu.dot_dimension_numbers<[1], [0], [0], [1], [0, 0, 1, 1], [], []>} : vector<2x128xf32>, vector<128x128xf32>, vector<2x128xf32> -> vector<2x128xf32>
    %186 = arith.addf %184, %185 : vector<2x128xf32>
    %187 = arith.negf %186 : vector<2x128xf32>
    %188 = math.exp %187 : vector<2x128xf32>
    %cst_90 = arith.constant 1.000000e+00 : f32
    %189 = vector.broadcast %cst_90 : f32 to vector<2x128xf32>
    %190 = arith.addf %189, %188 : vector<2x128xf32>
    %191 = arith.divf %189, %190 : vector<2x128xf32>
    %192 = math.tanh %186 : vector<2x128xf32>
    %c96_i32_91 = arith.constant 96 : i32
    %193 = tpu.dynamic_rotate %191 by %c96_i32_91 dim 1 : vector<2x128xf32>, i32 -> vector<2x128xf32>
    %c64_i32_92 = arith.constant 64 : i32
    %194 = tpu.dynamic_rotate %192 by %c64_i32_92 dim 1 : vector<2x128xf32>, i32 -> vector<2x128xf32>
    %c32_i32_93 = arith.constant 32 : i32
    %195 = tpu.dynamic_rotate %191 by %c32_i32_93 dim 1 : vector<2x128xf32>, i32 -> vector<2x128xf32>
    %196 = arith.mulf %193, %180 : vector<2x128xf32>
    %197 = arith.mulf %191, %194 : vector<2x128xf32>
    %198 = arith.addf %196, %197 : vector<2x128xf32>
    %199 = math.tanh %198 : vector<2x128xf32>
    %200 = arith.mulf %195, %199 : vector<2x128xf32>
    %c2_94 = arith.constant 2 : index
    %c0_95 = arith.constant 0 : index
    %201 = vector.load %arg9[%c2_94, %c0_95] : memref<16x128xf32, #tpu.memory_space<vmem>>, vector<2x128xf32>
    tpu.vector_store %arg9[%c2_94, %c0_95], %200 {strides = array<i32>} : memref<16x128xf32, #tpu.memory_space<vmem>>, vector<2x128xf32>,
    %c4_96 = arith.constant 4 : index
    %c0_97 = arith.constant 0 : index
    %202 = vector.load %arg10[%c4_96, %c0_97] : memref<16x128xf32, #tpu.memory_space<vmem>>, vector<2x128xf32>
    %cst_98 = arith.constant dense<0.000000e+00> : vector<2x128xf32>
    %203 = tpu.matmul %200, %163, %cst_98 {dimension_numbers = #tpu.dot_dimension_numbers<[1], [0], [0], [1], [0, 0, 1, 1], [], []>} : vector<2x128xf32>, vector<128x128xf32>, vector<2x128xf32> -> vector<2x128xf32>
    %204 = arith.addf %202, %203 : vector<2x128xf32>
    %205 = arith.negf %204 : vector<2x128xf32>
    %206 = math.exp %205 : vector<2x128xf32>
    %cst_99 = arith.constant 1.000000e+00 : f32
    %207 = vector.broadcast %cst_99 : f32 to vector<2x128xf32>
    %208 = arith.addf %207, %206 : vector<2x128xf32>
    %209 = arith.divf %207, %208 : vector<2x128xf32>
    %210 = math.tanh %204 : vector<2x128xf32>
    %c96_i32_100 = arith.constant 96 : i32
    %211 = tpu.dynamic_rotate %209 by %c96_i32_100 dim 1 : vector<2x128xf32>, i32 -> vector<2x128xf32>
    %c64_i32_101 = arith.constant 64 : i32
    %212 = tpu.dynamic_rotate %210 by %c64_i32_101 dim 1 : vector<2x128xf32>, i32 -> vector<2x128xf32>
    %c32_i32_102 = arith.constant 32 : i32
    %213 = tpu.dynamic_rotate %209 by %c32_i32_102 dim 1 : vector<2x128xf32>, i32 -> vector<2x128xf32>
    %214 = arith.mulf %211, %198 : vector<2x128xf32>
    %215 = arith.mulf %209, %212 : vector<2x128xf32>
    %216 = arith.addf %214, %215 : vector<2x128xf32>
    %217 = math.tanh %216 : vector<2x128xf32>
    %218 = arith.mulf %213, %217 : vector<2x128xf32>
    %c4_103 = arith.constant 4 : index
    %c0_104 = arith.constant 0 : index
    %219 = vector.load %arg9[%c4_103, %c0_104] : memref<16x128xf32, #tpu.memory_space<vmem>>, vector<2x128xf32>
    tpu.vector_store %arg9[%c4_103, %c0_104], %218 {strides = array<i32>} : memref<16x128xf32, #tpu.memory_space<vmem>>, vector<2x128xf32>,
    %c6_105 = arith.constant 6 : index
    %c0_106 = arith.constant 0 : index
    %220 = vector.load %arg10[%c6_105, %c0_106] : memref<16x128xf32, #tpu.memory_space<vmem>>, vector<2x128xf32>
    %cst_107 = arith.constant dense<0.000000e+00> : vector<2x128xf32>
    %221 = tpu.matmul %218, %163, %cst_107 {dimension_numbers = #tpu.dot_dimension_numbers<[1], [0], [0], [1], [0, 0, 1, 1], [], []>} : vector<2x128xf32>, vector<128x128xf32>, vector<2x128xf32> -> vector<2x128xf32>
    %222 = arith.addf %220, %221 : vector<2x128xf32>
    %223 = arith.negf %222 : vector<2x128xf32>
    %224 = math.exp %223 : vector<2x128xf32>
    %cst_108 = arith.constant 1.000000e+00 : f32
    %225 = vector.broadcast %cst_108 : f32 to vector<2x128xf32>
    %226 = arith.addf %225, %224 : vector<2x128xf32>
    %227 = arith.divf %225, %226 : vector<2x128xf32>
    %228 = math.tanh %222 : vector<2x128xf32>
    %c96_i32_109 = arith.constant 96 : i32
    %229 = tpu.dynamic_rotate %227 by %c96_i32_109 dim 1 : vector<2x128xf32>, i32 -> vector<2x128xf32>
    %c64_i32_110 = arith.constant 64 : i32
    %230 = tpu.dynamic_rotate %228 by %c64_i32_110 dim 1 : vector<2x128xf32>, i32 -> vector<2x128xf32>
    %c32_i32_111 = arith.constant 32 : i32
    %231 = tpu.dynamic_rotate %227 by %c32_i32_111 dim 1 : vector<2x128xf32>, i32 -> vector<2x128xf32>
    %232 = arith.mulf %229, %216 : vector<2x128xf32>
    %233 = arith.mulf %227, %230 : vector<2x128xf32>
    %234 = arith.addf %232, %233 : vector<2x128xf32>
    %235 = math.tanh %234 : vector<2x128xf32>
    %236 = arith.mulf %231, %235 : vector<2x128xf32>
    %c6_112 = arith.constant 6 : index
    %c0_113 = arith.constant 0 : index
    %237 = vector.load %arg9[%c6_112, %c0_113] : memref<16x128xf32, #tpu.memory_space<vmem>>, vector<2x128xf32>
    tpu.vector_store %arg9[%c6_112, %c0_113], %236 {strides = array<i32>} : memref<16x128xf32, #tpu.memory_space<vmem>>, vector<2x128xf32>,
    %c8_114 = arith.constant 8 : index
    %c0_115 = arith.constant 0 : index
    %238 = vector.load %arg10[%c8_114, %c0_115] : memref<16x128xf32, #tpu.memory_space<vmem>>, vector<2x128xf32>
    %cst_116 = arith.constant dense<0.000000e+00> : vector<2x128xf32>
    %239 = tpu.matmul %236, %163, %cst_116 {dimension_numbers = #tpu.dot_dimension_numbers<[1], [0], [0], [1], [0, 0, 1, 1], [], []>} : vector<2x128xf32>, vector<128x128xf32>, vector<2x128xf32> -> vector<2x128xf32>
    %240 = arith.addf %238, %239 : vector<2x128xf32>
    %241 = arith.negf %240 : vector<2x128xf32>
    %242 = math.exp %241 : vector<2x128xf32>
    %cst_117 = arith.constant 1.000000e+00 : f32
    %243 = vector.broadcast %cst_117 : f32 to vector<2x128xf32>
    %244 = arith.addf %243, %242 : vector<2x128xf32>
    %245 = arith.divf %243, %244 : vector<2x128xf32>
    %246 = math.tanh %240 : vector<2x128xf32>
    %c96_i32_118 = arith.constant 96 : i32
    %247 = tpu.dynamic_rotate %245 by %c96_i32_118 dim 1 : vector<2x128xf32>, i32 -> vector<2x128xf32>
    %c64_i32_119 = arith.constant 64 : i32
    %248 = tpu.dynamic_rotate %246 by %c64_i32_119 dim 1 : vector<2x128xf32>, i32 -> vector<2x128xf32>
    %c32_i32_120 = arith.constant 32 : i32
    %249 = tpu.dynamic_rotate %245 by %c32_i32_120 dim 1 : vector<2x128xf32>, i32 -> vector<2x128xf32>
    %250 = arith.mulf %247, %234 : vector<2x128xf32>
    %251 = arith.mulf %245, %248 : vector<2x128xf32>
    %252 = arith.addf %250, %251 : vector<2x128xf32>
    %253 = math.tanh %252 : vector<2x128xf32>
    %254 = arith.mulf %249, %253 : vector<2x128xf32>
    %c8_121 = arith.constant 8 : index
    %c0_122 = arith.constant 0 : index
    %255 = vector.load %arg9[%c8_121, %c0_122] : memref<16x128xf32, #tpu.memory_space<vmem>>, vector<2x128xf32>
    tpu.vector_store %arg9[%c8_121, %c0_122], %254 {strides = array<i32>} : memref<16x128xf32, #tpu.memory_space<vmem>>, vector<2x128xf32>,
    %c10_123 = arith.constant 10 : index
    %c0_124 = arith.constant 0 : index
    %256 = vector.load %arg10[%c10_123, %c0_124] : memref<16x128xf32, #tpu.memory_space<vmem>>, vector<2x128xf32>
    %cst_125 = arith.constant dense<0.000000e+00> : vector<2x128xf32>
    %257 = tpu.matmul %254, %163, %cst_125 {dimension_numbers = #tpu.dot_dimension_numbers<[1], [0], [0], [1], [0, 0, 1, 1], [], []>} : vector<2x128xf32>, vector<128x128xf32>, vector<2x128xf32> -> vector<2x128xf32>
    %258 = arith.addf %256, %257 : vector<2x128xf32>
    %259 = arith.negf %258 : vector<2x128xf32>
    %260 = math.exp %259 : vector<2x128xf32>
    %cst_126 = arith.constant 1.000000e+00 : f32
    %261 = vector.broadcast %cst_126 : f32 to vector<2x128xf32>
    %262 = arith.addf %261, %260 : vector<2x128xf32>
    %263 = arith.divf %261, %262 : vector<2x128xf32>
    %264 = math.tanh %258 : vector<2x128xf32>
    %c96_i32_127 = arith.constant 96 : i32
    %265 = tpu.dynamic_rotate %263 by %c96_i32_127 dim 1 : vector<2x128xf32>, i32 -> vector<2x128xf32>
    %c64_i32_128 = arith.constant 64 : i32
    %266 = tpu.dynamic_rotate %264 by %c64_i32_128 dim 1 : vector<2x128xf32>, i32 -> vector<2x128xf32>
    %c32_i32_129 = arith.constant 32 : i32
    %267 = tpu.dynamic_rotate %263 by %c32_i32_129 dim 1 : vector<2x128xf32>, i32 -> vector<2x128xf32>
    %268 = arith.mulf %265, %252 : vector<2x128xf32>
    %269 = arith.mulf %263, %266 : vector<2x128xf32>
    %270 = arith.addf %268, %269 : vector<2x128xf32>
    %271 = math.tanh %270 : vector<2x128xf32>
    %272 = arith.mulf %267, %271 : vector<2x128xf32>
    %c10_130 = arith.constant 10 : index
    %c0_131 = arith.constant 0 : index
    %273 = vector.load %arg9[%c10_130, %c0_131] : memref<16x128xf32, #tpu.memory_space<vmem>>, vector<2x128xf32>
    tpu.vector_store %arg9[%c10_130, %c0_131], %272 {strides = array<i32>} : memref<16x128xf32, #tpu.memory_space<vmem>>, vector<2x128xf32>,
    %c12_132 = arith.constant 12 : index
    %c0_133 = arith.constant 0 : index
    %274 = vector.load %arg10[%c12_132, %c0_133] : memref<16x128xf32, #tpu.memory_space<vmem>>, vector<2x128xf32>
    %cst_134 = arith.constant dense<0.000000e+00> : vector<2x128xf32>
    %275 = tpu.matmul %272, %163, %cst_134 {dimension_numbers = #tpu.dot_dimension_numbers<[1], [0], [0], [1], [0, 0, 1, 1], [], []>} : vector<2x128xf32>, vector<128x128xf32>, vector<2x128xf32> -> vector<2x128xf32>
    %276 = arith.addf %274, %275 : vector<2x128xf32>
    %277 = arith.negf %276 : vector<2x128xf32>
    %278 = math.exp %277 : vector<2x128xf32>
    %cst_135 = arith.constant 1.000000e+00 : f32
    %279 = vector.broadcast %cst_135 : f32 to vector<2x128xf32>
    %280 = arith.addf %279, %278 : vector<2x128xf32>
    %281 = arith.divf %279, %280 : vector<2x128xf32>
    %282 = math.tanh %276 : vector<2x128xf32>
    %c96_i32_136 = arith.constant 96 : i32
    %283 = tpu.dynamic_rotate %281 by %c96_i32_136 dim 1 : vector<2x128xf32>, i32 -> vector<2x128xf32>
    %c64_i32_137 = arith.constant 64 : i32
    %284 = tpu.dynamic_rotate %282 by %c64_i32_137 dim 1 : vector<2x128xf32>, i32 -> vector<2x128xf32>
    %c32_i32_138 = arith.constant 32 : i32
    %285 = tpu.dynamic_rotate %281 by %c32_i32_138 dim 1 : vector<2x128xf32>, i32 -> vector<2x128xf32>
    %286 = arith.mulf %283, %270 : vector<2x128xf32>
    %287 = arith.mulf %281, %284 : vector<2x128xf32>
    %288 = arith.addf %286, %287 : vector<2x128xf32>
    %289 = math.tanh %288 : vector<2x128xf32>
    %290 = arith.mulf %285, %289 : vector<2x128xf32>
    %c12_139 = arith.constant 12 : index
    %c0_140 = arith.constant 0 : index
    %291 = vector.load %arg9[%c12_139, %c0_140] : memref<16x128xf32, #tpu.memory_space<vmem>>, vector<2x128xf32>
    tpu.vector_store %arg9[%c12_139, %c0_140], %290 {strides = array<i32>} : memref<16x128xf32, #tpu.memory_space<vmem>>, vector<2x128xf32>,
    %c14_141 = arith.constant 14 : index
    %c0_142 = arith.constant 0 : index
    %292 = vector.load %arg10[%c14_141, %c0_142] : memref<16x128xf32, #tpu.memory_space<vmem>>, vector<2x128xf32>
    %cst_143 = arith.constant dense<0.000000e+00> : vector<2x128xf32>
    %293 = tpu.matmul %290, %163, %cst_143 {dimension_numbers = #tpu.dot_dimension_numbers<[1], [0], [0], [1], [0, 0, 1, 1], [], []>} : vector<2x128xf32>, vector<128x128xf32>, vector<2x128xf32> -> vector<2x128xf32>
    %294 = arith.addf %292, %293 : vector<2x128xf32>
    %295 = arith.negf %294 : vector<2x128xf32>
    %296 = math.exp %295 : vector<2x128xf32>
    %cst_144 = arith.constant 1.000000e+00 : f32
    %297 = vector.broadcast %cst_144 : f32 to vector<2x128xf32>
    %298 = arith.addf %297, %296 : vector<2x128xf32>
    %299 = arith.divf %297, %298 : vector<2x128xf32>
    %300 = math.tanh %294 : vector<2x128xf32>
    %c96_i32_145 = arith.constant 96 : i32
    %301 = tpu.dynamic_rotate %299 by %c96_i32_145 dim 1 : vector<2x128xf32>, i32 -> vector<2x128xf32>
    %c64_i32_146 = arith.constant 64 : i32
    %302 = tpu.dynamic_rotate %300 by %c64_i32_146 dim 1 : vector<2x128xf32>, i32 -> vector<2x128xf32>
    %c32_i32_147 = arith.constant 32 : i32
    %303 = tpu.dynamic_rotate %299 by %c32_i32_147 dim 1 : vector<2x128xf32>, i32 -> vector<2x128xf32>
    %304 = arith.mulf %301, %288 : vector<2x128xf32>
    %305 = arith.mulf %299, %302 : vector<2x128xf32>
    %306 = arith.addf %304, %305 : vector<2x128xf32>
    %307 = math.tanh %306 : vector<2x128xf32>
    %308 = arith.mulf %303, %307 : vector<2x128xf32>
    %c14_148 = arith.constant 14 : index
    %c0_149 = arith.constant 0 : index
    %309 = vector.load %arg9[%c14_148, %c0_149] : memref<16x128xf32, #tpu.memory_space<vmem>>, vector<2x128xf32>
    tpu.vector_store %arg9[%c14_148, %c0_149], %308 {strides = array<i32>} : memref<16x128xf32, #tpu.memory_space<vmem>>, vector<2x128xf32>,
    %c0_150 = arith.constant 0 : index
    %c0_151 = arith.constant 0 : index
    %310 = vector.load %arg9[%c0_150, %c0_151] : memref<16x128xf32, #tpu.memory_space<vmem>>, vector<16x128xf32>
    %c0_152 = arith.constant 0 : index
    %c0_153 = arith.constant 0 : index
    %311 = vector.load %arg6[%c0_152, %c0_153] : memref<128x128xf32, #tpu.memory_space<vmem>>, vector<128x128xf32>
    %cst_154 = arith.constant dense<0.000000e+00> : vector<16x128xf32>
    %312 = tpu.matmul %310, %311, %cst_154 {dimension_numbers = #tpu.dot_dimension_numbers<[1], [0], [0], [1], [0, 0, 1, 1], [], []>} : vector<16x128xf32>, vector<128x128xf32>, vector<16x128xf32> -> vector<16x128xf32>
    %c0_155 = arith.constant 0 : index
    %c0_156 = arith.constant 0 : index
    %313 = vector.load %arg7[%c0_155, %c0_156] : memref<1x128xf32, #tpu.memory_space<vmem>>, vector<1x128xf32>
    %314 = vector.broadcast %313 : vector<1x128xf32> to vector<16x128xf32>
    %315 = arith.addf %312, %314 : vector<16x128xf32>
    %c0_157 = arith.constant 0 : index
    %c0_158 = arith.constant 0 : index
    %316 = vector.load %arg8[%c0_157, %c0_158] : memref<16x128xf32, #tpu.memory_space<vmem>>, vector<16x128xf32>
    tpu.vector_store %arg8[%c0_157, %c0_158], %315 {strides = array<i32>} : memref<16x128xf32, #tpu.memory_space<vmem>>, vector<16x128xf32>,
    return
  }
}

</mosaic_0001>

<bundles_post_ra>
// kernel: tpu_custom_call.1
= control target key start
LH: loop header
LB: loop body
LE: loop exit
PB: predicated region body
PF: predicated region fallthrough
CT: control target
= control target key end

     0   :  { %13 = vsyncpa [#allocation5], 0  ;;  %s4322_s0 = inlined_call_operand.hbm [shape: f32[2,16], index: 0, kind: input, shape index: {}]   ;;  %s4323_s1 = inlined_call_operand.hbm [shape: f32[16,128], index: 1, kind: input, shape index: {}]   ;;  %s4324_s2 = inlined_call_operand.vmem [shape: f32[1,128], index: 2, kind: input, shape index: {}]   ;;  %s4325_s3 = inlined_call_operand.hbm [shape: f32[2,128,128], index: 3, kind: input, shape index: {}]   ;;  %s4326_s4 = inlined_call_operand.hbm [shape: f32[2,128,128], index: 4, kind: input, shape index: {}]   ;;  %s4327_s5 = inlined_call_operand.vmem [shape: f32[2,1,128], index: 5, kind: input, shape index: {}]   ;;  %s4328_s6 = inlined_call_operand.hbm [shape: f32[128,128], index: 6, kind: input, shape index: {}]   ;;  %s4329_s7 = inlined_call_operand.vmem [shape: f32[1,128], index: 7, kind: input, shape index: {}]   ;;  %s4330_s8 = inlined_call_operand.hbm [shape: f32[16,128], index: 8, kind: output, shape index: {}]  }
   0x1   :  { %14 = vsyncpa [#allocation8], 0 }
   0x2   :  { %15 = vsyncpa [#allocation11], 0 }
   0x3   :  { %16 = vsyncpa [#allocation6], 0  ;;  %s3758_s27 = smov [#allocation7]   ;;  %s3618_s9 = scalar_lea.hbm %s4323_s1, 256 }
   0x4   :  { %s32_s28 = sshll.u32 %s3758_s27, 4  ;;  %p3619_p0 = scmp.ne.s32.totalorder %s4323_s1, %s3618_s9  ;;  %s33_s28 = int_to_ptr.vmem [resolvable:$true] %s32_s28 }
   0x5   :  { %p3622_p1 = scmp.lt.u32.totalorder %s3618_s9, %s4323_s1 }
   0x7   :  { %p3624_p2 = pnand %p3622_p1, %p3619_p0 }
   0x9   :  { %3627 = shalt.err (!%p3624_p2)
}
   0xa   :  { %s3628_s14 = scalar_lea.vmem %s33_s28, 256  ;;  %p3633_p4 = scmp.lt.s32.totalorder %s33_s28, %s33_s28 }
   0xb   :  { %p3629_p3 = scmp.ne.s32.totalorder %s33_s28, %s3628_s14  ;;  %p3634_p5 = scmp.lt.s32.totalorder %s3628_s14, %s3628_s14 }
   0xd   :  { %p3635_p6 = por %p3634_p5, %p3633_p4 }
   0xf   :  { %p3636_p7 = pnand %p3635_p6, %p3629_p3 }
  0x11   :  { %3639 = shalt.err (!%p3636_p7)
}
  0x12   :  { %s3759_s15 = smov 128   ;;  %s3760_s16 = smov 8  }
  0x13   :  { %38 = dma.hbm_to_vmem [thread:$0]  %s4323_s1, 256, %s33_s28, [#allocation8], %s3759_s15, %s3759_s15, %s3760_s16  }
  0x14   :  { %s3761_s19 = smov [#allocation10]   ;;  %s3762_s21 = smov [#allocation4]  }
  0x15   :  { %s58_s20 = sshll.u32 %s3761_s19, 4  ;;  %s23_s22 = sshll.u32 %s3762_s21, 4  ;;  %s59_s20 = int_to_ptr.vmem [resolvable:$true] %s58_s20  ;;  %s24_s22 = int_to_ptr.vmem [resolvable:$true] %s23_s22 }
  0x16   :  { %s3640_s25 = scalar_lea.hbm %s4326_s4, 4096 }
  0x17   :  { %p3641_p8 = scmp.ne.s32.totalorder %s4326_s4, %s3640_s25  ;;  %p3644_p9 = scmp.lt.u32.totalorder %s3640_s25, %s4326_s4 }
  0x19   :  { %p3646_p10 = pnand %p3644_p9, %p3641_p8 }
  0x1b   :  { %3649 = shalt.err (!%p3646_p10)
}
  0x1c   :  { %s3650_s1 = scalar_lea.vmem %s59_s20, 4096  ;;  %p3655_p12 = scmp.lt.s32.totalorder %s59_s20, %s59_s20 }
  0x1d   :  { %p3651_p11 = scmp.ne.s32.totalorder %s59_s20, %s3650_s1  ;;  %p3656_p13 = scmp.lt.s32.totalorder %s3650_s1, %s3650_s1 }
  0x1f   :  { %p3657_p0 = por %p3656_p13, %p3655_p12 }
  0x21   :  { %p3658_p1 = pnand %p3657_p0, %p3651_p11 }
  0x23   :  { %3661 = shalt.err (!%p3658_p1)
}
  0x24   :  { %64 = dma.hbm_to_vmem [thread:$0]  %s4326_s4, 4096, %s59_s20, [#allocation11], %s3759_s15, %s3759_s15, %s3760_s16  }
  0x25   :  { %s3662_s12 = scalar_lea.hbm %s4322_s0, 32 }
  0x26   :  { %p3663_p2 = scmp.ne.s32.totalorder %s4322_s0, %s3662_s12  ;;  %p3666_p3 = scmp.lt.u32.totalorder %s3662_s12, %s4322_s0 }
  0x28   :  { %p3668_p4 = pnand %p3666_p3, %p3663_p2 }
  0x2a   :  { %3671 = shalt.err (!%p3668_p4)
}
  0x2b   :  { %s3672_s19 = scalar_lea.vmem %s24_s22, 32  ;;  %p3677_p6 = scmp.lt.s32.totalorder %s24_s22, %s24_s22 }
  0x2c   :  { %p3673_p5 = scmp.ne.s32.totalorder %s24_s22, %s3672_s19  ;;  %p3678_p7 = scmp.lt.s32.totalorder %s3672_s19, %s3672_s19 }
  0x2e   :  { %p3679_p8 = por %p3678_p7, %p3677_p6 }
  0x30   :  { %p3680_p9 = pnand %p3679_p8, %p3673_p5 }
  0x32   :  { %3683 = shalt.err (!%p3680_p9)
}
  0x33   :  { %26 = dma.hbm_to_vmem [thread:$0]  %s4322_s0, 32, %s24_s22, [#allocation5]  }
  0x34   :  { %s3763_s21 = smov [#allocation9]   ;;  %s3764_s24 = smov [#allocation12]  }
  0x35   :  { %s46_s23 = sshll.u32 %s3763_s21, 4  ;;  %s72_s25 = sshll.u32 %s3764_s24, 4  ;;  %s47_s23 = int_to_ptr.vmem [resolvable:$true] %s46_s23  ;;  %s73_s25 = int_to_ptr.vmem [resolvable:$true] %s72_s25 }
  0x36   :  { %s3684_s29 = scalar_lea.hbm %s4325_s3, 4096 }
  0x37   :  { %p3685_p10 = scmp.ne.s32.totalorder %s4325_s3, %s3684_s29  ;;  %p3688_p11 = scmp.lt.u32.totalorder %s3684_s29, %s4325_s3 }
  0x39   :  { %p3690_p12 = pnand %p3688_p11, %p3685_p10 }
  0x3b   :  { %3693 = shalt.err (!%p3690_p12)
}
  0x3c   :  { %s3694_s0 = scalar_lea.vmem %s47_s23, 4096  ;;  %p3699_p0 = scmp.lt.s32.totalorder %s47_s23, %s47_s23 }
  0x3d   :  { %p3695_p13 = scmp.ne.s32.totalorder %s47_s23, %s3694_s0  ;;  %p3700_p1 = scmp.lt.s32.totalorder %s3694_s0, %s3694_s0 }
  0x3f   :  { %p3701_p2 = por %p3700_p1, %p3699_p0 }
  0x41   :  { %p3702_p3 = pnand %p3701_p2, %p3695_p13 }
  0x43   :  { %3705 = shalt.err (!%p3702_p3)
}
  0x44   :  { %52 = dma.hbm_to_vmem [thread:$0]  %s4325_s3, 4096, %s47_s23, [#allocation8], %s3759_s15, %s3759_s15, %s3760_s16  }
  0x45   :  { %s3706_s13 = scalar_lea.hbm %s4328_s6, 2048 }
  0x46   :  { %p3707_p4 = scmp.ne.s32.totalorder %s4328_s6, %s3706_s13  ;;  %p3710_p5 = scmp.lt.u32.totalorder %s3706_s13, %s4328_s6 }
  0x48   :  { %p3712_p6 = pnand %p3710_p5, %p3707_p4 }
  0x4a   :  { %3715 = shalt.err (!%p3712_p6)
}
  0x4b   :  { %s3716_s4 = scalar_lea.vmem %s73_s25, 2048  ;;  %p3721_p8 = scmp.lt.s32.totalorder %s73_s25, %s73_s25 }
  0x4c   :  { %p3717_p7 = scmp.ne.s32.totalorder %s73_s25, %s3716_s4  ;;  %p3722_p9 = scmp.lt.s32.totalorder %s3716_s4, %s3716_s4 }
  0x4e   :  { %p3723_p10 = por %p3722_p9, %p3721_p8 }
  0x50   :  { %p3724_p11 = pnand %p3723_p10, %p3717_p7 }
  0x52   :  { %3727 = shalt.err (!%p3724_p11)
}
  0x53   :  { %78 = dma.hbm_to_vmem [thread:$0]  %s4328_s6, 2048, %s73_s25, [#allocation11], %s3759_s15, %s3759_s15, %s3760_s16  }
  0x54   :  { %3750 = dma.done.wait [#allocation5], 32  }
  0x55   :  { %3751 = vsyncadd [#allocation5], 4294967264 }
  0x56   :  { %3752 = dma.done.wait [#allocation8], 4352  }
  0x57   :  { %3753 = vsyncadd [#allocation8], 4294962944 }
  0x58   :  { %3754 = dma.done.wait [#allocation11], 6144  }
  0x59   :  { %3755 = vsyncadd [#allocation11], 4294961152  ;;  %v3765_v0 = vmov 0.0|0.0   ;;  %vm3766_vm0 = vmmov 0   ;;  %v3767_v1 = vmov 0.0   ;;  %v97_v2 = vld [vmem:[#allocation7] sm:$0xff] }
  0x5a   :  { %3001 = vmatprep.subr.bf16.mxu0 %v3765_v0  ;;  %2333 = vmatprep.mubr.msk.f32.mxu0 %vm3766_vm0, %v3767_v1  ;;  %v98_v3 = vld [vmem:[#allocation7 + $0x8] sm:$0xff]  ;;  %v181_v5 = vld [vmem:[#allocation9] sm:$0xff]  ;;  %v182_v6 = vld [vmem:[#allocation9 + $0x8] sm:$0xff]  ;;  %vm106_vm1 = vcmask 130048   ;;  %s3768_s24 = smov 32   ;;  %s3769_s25 = smov 96  }
  0x5b   :  { %3004 = vmatprep.subr.bf16.mxu1 %v3765_v0  ;;  %2368 = vmatprep.mubr.msk.f32.mxu1 %vm3766_vm0, %v3767_v1  ;;  %v3002_v4 = vpack.c.bf16 %v98_v3, %v97_v2  ;;  %v273_v7 = vld [vmem:[#allocation10] sm:$0xff]  ;;  %v3005_v8 = vpack.c.bf16 %v182_v6, %v181_v5  ;;  %v274_v9 = vld [vmem:[#allocation10 + $0x8] sm:$0xff]  ;;  %v183_v10 = vld [vmem:[#allocation9 + $0x10] sm:$0xff]  ;;  %s3770_s26 = smov 64   ;;  %s3771_s1 = smov [#allocation13]  }
  0x5c   :  { %v184_v11 = vld [vmem:[#allocation9 + $0x18] sm:$0xff]  ;;  %v96_v12 = vld [vmem:[#allocation4] sm:$0x3]  ;;  %v3895_v13 = vpack.c.bf16 %v274_v9, %v273_v7  ;;  %v275_v15 = vld [vmem:[#allocation10 + $0x10] sm:$0xff]  ;;  %s1965_s28 = sshll.u32 %s3771_s1, 4  ;;  %s1966_s28 = int_to_ptr.vmem [resolvable:$true] %s1965_s28 }
  0x5d   :  { %3003 = vmatpush3.bf16.msra.mxu0 %v3002_v4  ;;  %3006 = vmatpush3.bf16.msra.mxu1 %v3005_v8  ;;  %v3008_v14 = vpack.c.bf16 %v184_v11, %v183_v10  ;;  %v276_v16 = vld [vmem:[#allocation10 + $0x18] sm:$0xff]  ;;  %v185_v17 = vld [vmem:[#allocation9 + $0x20] sm:$0xff]  ;;  %v186_v18 = vld [vmem:[#allocation9 + $0x28] sm:$0xff]  ;;  %s3728_s9 = scalar_lea.vmem %s1966_s28, 256  ;;  %p3733_p13 = scmp.lt.s32.totalorder %s1966_s28, %s1966_s28 }
  0x5e   :  { %3028 = vmatprep.subr.bf16.mxu0 %v3765_v0  ;;  %3007 = vmatprep.subr.bf16.mxu1 %v3765_v0  ;;  %v3900_v19 = vpack.c.bf16 %v276_v16, %v275_v15  ;;  %v3011_v20 = vpack.c.bf16 %v186_v18, %v185_v17  ;;  %v277_v21 = vld [vmem:[#allocation10 + $0x20] sm:$0xff]  ;;  %v278_v22 = vld [vmem:[#allocation10 + $0x28] sm:$0xff]  ;;  %v187_v23 = vld [vmem:[#allocation9 + $0x30] sm:$0xff]  ;;  %p3729_p12 = scmp.ne.s32.totalorder %s1966_s28, %s3728_s9  ;;  %p3734_p0 = scmp.lt.s32.totalorder %s3728_s9, %s3728_s9 }
  0x5f   :  { %v188_v24 = vld [vmem:[#allocation9 + $0x38] sm:$0xff]  ;;  %v3907_v25 = vpack.c.bf16 %v278_v22, %v277_v21  ;;  %v279_v27 = vld [vmem:[#allocation10 + $0x30] sm:$0xff]  ;;  %v189_v29 = vld [vmem:[#allocation9 + $0x40] sm:$0xff] }
  0x60   :  { %2334 = vmatmul.mubr.msk.f32.vlgmr.msra.gmra.mrb[0].mxu0 %vm106_vm1, %v96_v12  ;;  %v3014_v26 = vpack.c.bf16 %v188_v24, %v187_v23  ;;  %v280_v28 = vld [vmem:[#allocation10 + $0x38] sm:$0xff]  ;;  %v190_v30 = vld [vmem:[#allocation9 + $0x48] sm:$0xff]  ;;  %v281_v33 = vld [vmem:[#allocation10 + $0x40] sm:$0xff]  ;;  %p3735_p1 = por %p3734_p0, %p3733_p13 }
  0x61   :  { %3030 = vmatpush3.bf16.msra.mxu0 %v3895_v13  ;;  %2403 = vmatprep.mubr.msk.f32.mxu0 %vm3766_vm0, %v3767_v1  ;;  %v3912_v31 = vpack.c.bf16 %v280_v28, %v279_v27  ;;  %v3017_v32 = vpack.c.bf16 %v190_v30, %v189_v29  ;;  %v282_v34 = vld [vmem:[#allocation10 + $0x48] sm:$0xff]  ;;  %v191_v35 = vld [vmem:[#allocation9 + $0x50] sm:$0xff]  ;;  %v192_v36 = vld [vmem:[#allocation9 + $0x58] sm:$0xff] }
  0x62   :  { %3009 = vmatpush3.bf16.msra.mxu1 %v3008_v14  ;;  %3031 = vmatprep.subr.bf16.mxu0 %v3765_v0  ;;  %v3917_v37 = vpack.c.bf16 %v282_v34, %v281_v33  ;;  %v3020_v38 = vpack.c.bf16 %v192_v36, %v191_v35  ;;  %v283_v39 = vld [vmem:[#allocation10 + $0x50] sm:$0xff]  ;;  %v284_v40 = vld [vmem:[#allocation10 + $0x58] sm:$0xff]  ;;  %v193_v41 = vld [vmem:[#allocation9 + $0x60] sm:$0xff]  ;;  %p3736_p2 = pnand %p3735_p1, %p3729_p12 }
  0x63   :  { %3010 = vmatprep.subr.bf16.mxu1 %v3765_v0  ;;  %v194_v42 = vld [vmem:[#allocation9 + $0x68] sm:$0xff]  ;;  %v3922_v43 = vpack.c.bf16 %v284_v40, %v283_v39  ;;  %v285_v45 = vld [vmem:[#allocation10 + $0x60] sm:$0xff]  ;;  %v195_v48 = vld [vmem:[#allocation9 + $0x70] sm:$0xff] }
  0x64   :  { %v3023_v44 = vpack.c.bf16 %v194_v42, %v193_v41  ;;  %v286_v46 = vld [vmem:[#allocation10 + $0x68] sm:$0xff]  ;;  %v196_v49 = vld [vmem:[#allocation9 + $0x78] sm:$0xff]  ;;  %v287_v51 = vld [vmem:[#allocation10 + $0x70] sm:$0xff] }
  0x65   :  { %3033 = vmatpush3.bf16.msra.mxu0 %v3900_v19  ;;  %v3927_v47 = vpack.c.bf16 %v286_v46, %v285_v45  ;;  %v3026_v50 = vpack.c.bf16 %v196_v49, %v195_v48  ;;  %v288_v52 = vld [vmem:[#allocation10 + $0x78] sm:$0xff]  ;;  %v1979_v54 = vld [vmem:[%s4324_s2] ss:$0 sm:$0xff] }
  0x66   :  { %3012 = vmatpush3.bf16.msra.mxu1 %v3011_v20  ;;  %3034 = vmatprep.subr.bf16.mxu0 %v3765_v0  ;;  %v3933_v53 = vpack.c.bf16 %v288_v52, %v287_v51  ;;  %v1981_v60 = vld [vmem:[%s4327_s5] ss:$0 sm:$0xff] }
  0x67   :  { %3013 = vmatprep.subr.bf16.mxu1 %v3765_v0 }
  0x69   :  { %3036 = vmatpush3.bf16.msra.mxu0 %v3907_v25 }
  0x6a   :  { %3015 = vmatpush3.bf16.msra.mxu1 %v3014_v26  ;;  %3037 = vmatprep.subr.bf16.mxu0 %v3765_v0 }
  0x6b   :  { %3016 = vmatprep.subr.bf16.mxu1 %v3765_v0 }
  0x6d   :  { %3039 = vmatpush3.bf16.msra.mxu0 %v3912_v31 }
  0x6e   :  { %3018 = vmatpush3.bf16.msra.mxu1 %v3017_v32  ;;  %3040 = vmatprep.subr.bf16.mxu0 %v3765_v0 }
  0x6f   :  { %3019 = vmatprep.subr.bf16.mxu1 %v3765_v0 }
  0x71   :  { %3042 = vmatpush3.bf16.msra.mxu0 %v3917_v37 }
  0x72   :  { %3021 = vmatpush3.bf16.msra.mxu1 %v3020_v38  ;;  %3043 = vmatprep.subr.bf16.mxu0 %v3765_v0 }
  0x73   :  { %3022 = vmatprep.subr.bf16.mxu1 %v3765_v0 }
  0x75   :  { %3045 = vmatpush3.bf16.msra.mxu0 %v3922_v43 }
  0x76   :  { %3024 = vmatpush3.bf16.msra.mxu1 %v3023_v44  ;;  %3046 = vmatprep.subr.bf16.mxu0 %v3765_v0 }
  0x77   :  { %3025 = vmatprep.subr.bf16.mxu1 %v3765_v0 }
  0x79   :  { %3048 = vmatpush3.bf16.msra.mxu0 %v3927_v47 }
  0x7a   :  { %3049 = vmatprep.subr.bf16.mxu0 %v3765_v0  ;;  %3027 = vmatpush3.bf16.msra.mxu1 %v3026_v50 }
  0x7b   :  { %3052 = vmatprep.subr.bf16.mxu1 %v3765_v0 }
  0x7d   :  { %3051 = vmatpush3.bf16.msra.mxu0 %v3933_v53 }
  0x7e   :  { %3076 = vmatprep.subr.bf16.mxu0 %v3765_v0 }
  0x80   :  { %2404 = vmatmul.mubr.f32.vlgmr.msra.gmra.mrb[2].mxu0 %v3767_v1 }
  0x81   :  { %3078 = vmatpush3.bf16.msra.mxu0 %v3895_v13  ;;  %2473 = vmatprep.mubr.msk.f32.mxu0 %vm3766_vm0, %v3767_v1 }
  0x82   :  { %3079 = vmatprep.subr.bf16.mxu0 %v3765_v0 }
  0x85   :  { %3081 = vmatpush3.bf16.msra.mxu0 %v3900_v19 }
  0x86   :  { %3082 = vmatprep.subr.bf16.mxu0 %v3765_v0 }
  0x89   :  { %3084 = vmatpush3.bf16.msra.mxu0 %v3907_v25 }
  0x8a   :  { %3085 = vmatprep.subr.bf16.mxu0 %v3765_v0 }
  0x8d   :  { %3087 = vmatpush3.bf16.msra.mxu0 %v3912_v31 }
  0x8e   :  { %3088 = vmatprep.subr.bf16.mxu0 %v3765_v0 }
  0x91   :  { %3090 = vmatpush3.bf16.msra.mxu0 %v3917_v37 }
  0x92   :  { %3091 = vmatprep.subr.bf16.mxu0 %v3765_v0 }
  0x95   :  { %3093 = vmatpush3.bf16.msra.mxu0 %v3922_v43 }
  0x96   :  { %3094 = vmatprep.subr.bf16.mxu0 %v3765_v0 }
  0x99   :  { %3096 = vmatpush3.bf16.msra.mxu0 %v3927_v47 }
  0x9a   :  { %3097 = vmatprep.subr.bf16.mxu0 %v3765_v0 }
  0x9d   :  { %3099 = vmatpush3.bf16.msra.mxu0 %v3933_v53 }
  0x9e   :  { %3124 = vmatprep.subr.bf16.mxu0 %v3765_v0 }
 0x133   :  { %v176_v55 = vpop.f32.mrb[0].mxu0 }
 0x134   :  { %v177_v56 = vadd.f32 %v1979_v54, %v176_v55  ;;  %v2335_v57 = vpop.f32.mrb[1].mxu0 }
 0x136   :  { %2369 = vmatmul.mubr.f32.vlgmr.msra.gmra.mrb[0].mxu1 %v177_v56 }
 0x137   :  { %3054 = vmatpush3.bf16.msra.mxu1 %v3895_v13  ;;  %2438 = vmatprep.mubr.msk.f32.mxu1 %vm3766_vm0, %v3767_v1 }
 0x138   :  { %3055 = vmatprep.subr.bf16.mxu1 %v3765_v0 }
 0x13b   :  { %3057 = vmatpush3.bf16.msra.mxu1 %v3900_v19 }
 0x13c   :  { %3058 = vmatprep.subr.bf16.mxu1 %v3765_v0 }
 0x13f   :  { %3060 = vmatpush3.bf16.msra.mxu1 %v3907_v25 }
 0x140   :  { %3061 = vmatprep.subr.bf16.mxu1 %v3765_v0 }
 0x143   :  { %3063 = vmatpush3.bf16.msra.mxu1 %v3912_v31 }
 0x144   :  { %3064 = vmatprep.subr.bf16.mxu1 %v3765_v0 }
 0x147   :  { %3066 = vmatpush3.bf16.msra.mxu1 %v3917_v37 }
 0x148   :  { %3067 = vmatprep.subr.bf16.mxu1 %v3765_v0 }
 0x14b   :  { %3069 = vmatpush3.bf16.msra.mxu1 %v3922_v43 }
 0x14c   :  { %3070 = vmatprep.subr.bf16.mxu1 %v3765_v0 }
 0x14f   :  { %3072 = vmatpush3.bf16.msra.mxu1 %v3927_v47 }
 0x150   :  { %3073 = vmatprep.subr.bf16.mxu1 %v3765_v0 }
 0x153   :  { %3075 = vmatpush3.bf16.msra.mxu1 %v3933_v53  ;;  %v355_v58 = vpop.f32.mrb[2].mxu0 }
 0x154   :  { %3100 = vmatprep.subr.bf16.mxu1 %v3765_v0  ;;  %v2405_v59 = vpop.f32.mrb[3].mxu0 }
 0x209   :  { %v269_v61 = vpop.f32.mrb[0].mxu1 }
 0x20a   :  { %v3981_v62 = vadd.f32 %v1981_v60, %v269_v61  ;;  %v2370_v63 = vpop.f32.mrb[1].mxu1 }
 0x20c   :  { %v359_v2 = vadd.f32 %v355_v58, %v3981_v62 }
 0x20e   :  { %v1982_v3 = vmul.f32 -1.442695, %v359_v2 }
 0x210   :  { %3490 = vpow2.f32 %v1982_v3 }
 0x21a   :  { %v3491_v4 = vpop.eup %3490 }
 0x21b   :  { %v363_v5 = vadd.f32 1.0, %v3491_v4 }
 0x21d   :  { %3492 = vrcp.f32 %v363_v5 }
 0x21e   :  { %3494 = vtanh.f32 %v359_v2 }
 0x227   :  { %v3493_v6 = vpop.eup %3492 }
 0x228   :  { %371 = vrot.lane.b32.xlu1 %v3493_v6, %s3768_s24  ;;  %367 = vrot.lane.b32.xlu0 %v3493_v6, %s3769_s25  ;;  %v3495_v7 = vpop.eup %3494 }
 0x22c   :  { %369 = vrot.lane.b32.xlu0 %v3495_v7, %s3770_s26 }
 0x29a   :  { %v368_v8 = vpop.permute.xlu0 %367  ;;  %v372_v15 = vpop.permute.xlu1 %371 }
 0x29b   :  { %v373_v10 = vmul.f32 0.0, %v368_v8 }
 0x29e   :  { %v370_v9 = vpop.permute.xlu0 %369 }
 0x29f   :  { %v374_v11 = vmul.f32 %v3493_v6, %v370_v9 }
 0x2a1   :  { %v375_v12 = vadd.f32 %v374_v11, %v373_v10 }
 0x2a3   :  { %3496 = vtanh.f32 %v375_v12 }
 0x2ad   :  { %v3497_v14 = vpop.eup %3496 }
 0x2ae   :  { %v377_v16 = vmul.f32 %v3497_v14, %v372_v15 }
 0x2b0   :  { %378 = vst [vmem:[#allocation2] sm:$0x3] %v377_v16  ;;  %2439 = vmatmul.mubr.f32.vlgmr.msra.gmra.mrb[2].mxu1 %v377_v16 }
 0x2b1   :  { %3102 = vmatpush3.bf16.msra.mxu1 %v3895_v13  ;;  %2508 = vmatprep.mubr.msk.f32.mxu1 %vm3766_vm0, %v3767_v1 }
 0x2b2   :  { %3103 = vmatprep.subr.bf16.mxu1 %v3765_v0 }
 0x2b5   :  { %3105 = vmatpush3.bf16.msra.mxu1 %v3900_v19 }
 0x2b6   :  { %3106 = vmatprep.subr.bf16.mxu1 %v3765_v0 }
 0x2b9   :  { %3108 = vmatpush3.bf16.msra.mxu1 %v3907_v25 }
 0x2ba   :  { %3109 = vmatprep.subr.bf16.mxu1 %v3765_v0 }
 0x2bd   :  { %3111 = vmatpush3.bf16.msra.mxu1 %v3912_v31 }
 0x2be   :  { %3112 = vmatprep.subr.bf16.mxu1 %v3765_v0 }
 0x2c1   :  { %3114 = vmatpush3.bf16.msra.mxu1 %v3917_v37 }
 0x2c2   :  { %3115 = vmatprep.subr.bf16.mxu1 %v3765_v0 }
 0x2c5   :  { %3117 = vmatpush3.bf16.msra.mxu1 %v3922_v43 }
 0x2c6   :  { %3118 = vmatprep.subr.bf16.mxu1 %v3765_v0 }
 0x2c9   :  { %3120 = vmatpush3.bf16.msra.mxu1 %v3927_v47 }
 0x2ca   :  { %3121 = vmatprep.subr.bf16.mxu1 %v3765_v0 }
 0x2cd   :  { %3123 = vmatpush3.bf16.msra.mxu1 %v3933_v53 }
 0x2ce   :  { %3148 = vmatprep.subr.bf16.mxu1 %v3765_v0 }
 0x383   :  { %v445_v17 = vpop.f32.mrb[2].mxu1 }
 0x384   :  { %v449_v18 = vadd.f32 %v445_v17, %v3981_v62  ;;  %v2440_v20 = vpop.f32.mrb[3].mxu1 }
 0x386   :  { %v1983_v21 = vmul.f32 -1.442695, %v449_v18  ;;  %3498 = vtanh.f32 %v449_v18 }
 0x388   :  { %3500 = vpow2.f32 %v1983_v21 }
 0x390   :  { %v3499_v22 = vpop.eup %3498 }
 0x391   :  { %459 = vrot.lane.b32.xlu0 %v3499_v22, %s3770_s26 }
 0x392   :  { %v3501_v23 = vpop.eup %3500 }
 0x393   :  { %v453_v24 = vadd.f32 1.0, %v3501_v23 }
 0x395   :  { %3502 = vrcp.f32 %v453_v24 }
 0x39f   :  { %v3503_v26 = vpop.eup %3502 }
 0x3a0   :  { %457 = vrot.lane.b32.xlu1 %v3503_v26, %s3769_s25 }
 0x3a4   :  { %461 = vrot.lane.b32.xlu1 %v3503_v26, %s3768_s24 }
 0x403   :  { %v460_v27 = vpop.permute.xlu0 %459 }
 0x404   :  { %v464_v29 = vmul.f32 %v3503_v26, %v460_v27 }
 0x412   :  { %v458_v28 = vpop.permute.xlu1 %457 }
 0x413   :  { %v463_v30 = vmul.f32 %v458_v28, %v375_v12 }
 0x415   :  { %v465_v32 = vadd.f32 %v464_v29, %v463_v30 }
 0x416   :  { %v462_v34 = vpop.permute.xlu1 %461 }
 0x417   :  { %3504 = vtanh.f32 %v465_v32 }
 0x421   :  { %v3505_v33 = vpop.eup %3504 }
 0x422   :  { %v467_v35 = vmul.f32 %v3505_v33, %v462_v34 }
 0x424   :  { %468 = vst [vmem:[#allocation2 + $0x2] sm:$0x3] %v467_v35  ;;  %2474 = vmatmul.mubr.f32.vlgmr.msra.gmra.mrb[4].mxu0 %v467_v35 }
 0x425   :  { %3126 = vmatpush3.bf16.msra.mxu0 %v3895_v13  ;;  %2543 = vmatprep.mubr.msk.f32.mxu0 %vm3766_vm0, %v3767_v1 }
 0x426   :  { %3127 = vmatprep.subr.bf16.mxu0 %v3765_v0 }
 0x429   :  { %3129 = vmatpush3.bf16.msra.mxu0 %v3900_v19 }
 0x42a   :  { %3130 = vmatprep.subr.bf16.mxu0 %v3765_v0 }
 0x42d   :  { %3132 = vmatpush3.bf16.msra.mxu0 %v3907_v25 }
 0x42e   :  { %3133 = vmatprep.subr.bf16.mxu0 %v3765_v0 }
 0x431   :  { %3135 = vmatpush3.bf16.msra.mxu0 %v3912_v31 }
 0x432   :  { %3136 = vmatprep.subr.bf16.mxu0 %v3765_v0 }
 0x435   :  { %3138 = vmatpush3.bf16.msra.mxu0 %v3917_v37 }
 0x436   :  { %3139 = vmatprep.subr.bf16.mxu0 %v3765_v0 }
 0x439   :  { %3141 = vmatpush3.bf16.msra.mxu0 %v3922_v43 }
 0x43a   :  { %3142 = vmatprep.subr.bf16.mxu0 %v3765_v0 }
 0x43d   :  { %3144 = vmatpush3.bf16.msra.mxu0 %v3927_v47 }
 0x43e   :  { %3145 = vmatprep.subr.bf16.mxu0 %v3765_v0 }
 0x441   :  { %3147 = vmatpush3.bf16.msra.mxu0 %v3933_v53 }
 0x442   :  { %3172 = vmatprep.subr.bf16.mxu0 %v3765_v0 }
 0x4f7   :  { %v535_v36 = vpop.f32.mrb[4].mxu0 }
 0x4f8   :  { %v539_v38 = vadd.f32 %v535_v36, %v3981_v62  ;;  %v2475_v39 = vpop.f32.mrb[5].mxu0 }
 0x4fa   :  { %v1984_v40 = vmul.f32 -1.442695, %v539_v38  ;;  %3506 = vtanh.f32 %v539_v38 }
 0x4fc   :  { %3508 = vpow2.f32 %v1984_v40 }
 0x504   :  { %v3507_v41 = vpop.eup %3506 }
 0x505   :  { %549 = vrot.lane.b32.xlu1 %v3507_v41, %s3770_s26 }
 0x506   :  { %v3509_v42 = vpop.eup %3508 }
 0x507   :  { %v543_v44 = vadd.f32 1.0, %v3509_v42 }
 0x509   :  { %3510 = vrcp.f32 %v543_v44 }
 0x513   :  { %v3511_v45 = vpop.eup %3510 }
 0x514   :  { %547 = vrot.lane.b32.xlu0 %v3511_v45, %s3769_s25 }
 0x518   :  { %551 = vrot.lane.b32.xlu0 %v3511_v45, %s3768_s24 }
 0x577   :  { %v550_v46 = vpop.permute.xlu1 %549 }
 0x578   :  { %v554_v49 = vmul.f32 %v3511_v45, %v550_v46 }
 0x586   :  { %v548_v48 = vpop.permute.xlu0 %547 }
 0x587   :  { %v553_v50 = vmul.f32 %v548_v48, %v465_v32 }
 0x589   :  { %v555_v51 = vadd.f32 %v554_v49, %v553_v50 }
 0x58a   :  { %v552_v54 = vpop.permute.xlu0 %551 }
 0x58b   :  { %3512 = vtanh.f32 %v555_v51 }
 0x595   :  { %v3513_v52 = vpop.eup %3512 }
 0x596   :  { %v557_v55 = vmul.f32 %v3513_v52, %v552_v54 }
 0x598   :  { %558 = vst [vmem:[#allocation2 + $0x4] sm:$0x3] %v557_v55  ;;  %2509 = vmatmul.mubr.f32.vlgmr.msra.gmra.mrb[4].mxu1 %v557_v55 }
 0x599   :  { %3150 = vmatpush3.bf16.msra.mxu1 %v3895_v13  ;;  %2578 = vmatprep.mubr.msk.f32.mxu1 %vm3766_vm0, %v3767_v1 }
 0x59a   :  { %3151 = vmatprep.subr.bf16.mxu1 %v3765_v0 }
 0x59d   :  { %3153 = vmatpush3.bf16.msra.mxu1 %v3900_v19 }
 0x59e   :  { %3154 = vmatprep.subr.bf16.mxu1 %v3765_v0 }
 0x5a1   :  { %3156 = vmatpush3.bf16.msra.mxu1 %v3907_v25 }
 0x5a2   :  { %3157 = vmatprep.subr.bf16.mxu1 %v3765_v0 }
 0x5a5   :  { %3159 = vmatpush3.bf16.msra.mxu1 %v3912_v31 }
 0x5a6   :  { %3160 = vmatprep.subr.bf16.mxu1 %v3765_v0 }
 0x5a9   :  { %3162 = vmatpush3.bf16.msra.mxu1 %v3917_v37 }
 0x5aa   :  { %3163 = vmatprep.subr.bf16.mxu1 %v3765_v0 }
 0x5ad   :  { %3165 = vmatpush3.bf16.msra.mxu1 %v3922_v43 }
 0x5ae   :  { %3166 = vmatprep.subr.bf16.mxu1 %v3765_v0 }
 0x5b1   :  { %3168 = vmatpush3.bf16.msra.mxu1 %v3927_v47 }
 0x5b2   :  { %3169 = vmatprep.subr.bf16.mxu1 %v3765_v0 }
 0x5b5   :  { %3171 = vmatpush3.bf16.msra.mxu1 %v3933_v53 }
 0x5b6   :  { %3196 = vmatprep.subr.bf16.mxu1 %v3765_v0 }
 0x66b   :  { %v625_v56 = vpop.f32.mrb[4].mxu1 }
 0x66c   :  { %v629_v57 = vadd.f32 %v625_v56, %v3981_v62  ;;  %v2510_v58 = vpop.f32.mrb[5].mxu1 }
 0x66e   :  { %v1985_v59 = vmul.f32 -1.442695, %v629_v57  ;;  %3514 = vtanh.f32 %v629_v57 }
 0x670   :  { %3516 = vpow2.f32 %v1985_v59 }
 0x678   :  { %v3515_v60 = vpop.eup %3514 }
 0x679   :  { %639 = vrot.lane.b32.xlu0 %v3515_v60, %s3770_s26 }
 0x67a   :  { %v3517_v61 = vpop.eup %3516 }
 0x67b   :  { %v633_v63 = vadd.f32 1.0, %v3517_v61 }
 0x67d   :  { %3518 = vrcp.f32 %v633_v63 }
 0x687   :  { %v3519_v2 = vpop.eup %3518 }
 0x688   :  { %637 = vrot.lane.b32.xlu1 %v3519_v2, %s3769_s25 }
 0x68c   :  { %641 = vrot.lane.b32.xlu1 %v3519_v2, %s3768_s24 }
 0x6eb   :  { %v640_v3 = vpop.permute.xlu0 %639 }
 0x6ec   :  { %v644_v5 = vmul.f32 %v3519_v2, %v640_v3  ;;  %v1014_v2 = vld [vmem:[#allocation9 + $0x80] sm:$0xff]  ;;  %v1015_v3 = vld [vmem:[#allocation9 + $0x88] sm:$0xff] }
 0x6fa   :  { %v638_v4 = vpop.permute.xlu1 %637 }
 0x6fb   :  { %v643_v6 = vmul.f32 %v638_v4, %v555_v51  ;;  %v1016_v4 = vld [vmem:[#allocation9 + $0x90] sm:$0xff] }
 0x6fd   :  { %v645_v7 = vadd.f32 %v644_v5, %v643_v6  ;;  %v3220_v5 = vpack.c.bf16 %v1015_v3, %v1014_v2  ;;  %v1017_v6 = vld [vmem:[#allocation9 + $0x98] sm:$0xff] }
 0x6fe   :  { %v642_v9 = vpop.permute.xlu1 %641 }
 0x6ff   :  { %3520 = vtanh.f32 %v645_v7 }
 0x709   :  { %v3521_v8 = vpop.eup %3520 }
 0x70a   :  { %v647_v10 = vmul.f32 %v3521_v8, %v642_v9  ;;  %v3224_v8 = vpack.c.bf16 %v1017_v6, %v1016_v4  ;;  %v1991_v4 = vld [vmem:[%s4327_s5 + $0x1] ss:$0 sm:$0xff] }
 0x70c   :  { %648 = vst [vmem:[#allocation2 + $0x6] sm:$0x3] %v647_v10  ;;  %2544 = vmatmul.mubr.f32.vlgmr.msra.gmra.mrb[6].mxu0 %v647_v10  ;;  %v1018_v10 = vld [vmem:[#allocation9 + $0xa0] sm:$0xff] }
 0x70d   :  { %3174 = vmatpush3.bf16.msra.mxu0 %v3895_v13  ;;  %2613 = vmatprep.mubr.msk.f32.mxu0 %vm3766_vm0, %v3767_v1 }
 0x70e   :  { %3175 = vmatprep.subr.bf16.mxu0 %v3765_v0 }
 0x711   :  { %3177 = vmatpush3.bf16.msra.mxu0 %v3900_v19 }
 0x712   :  { %3178 = vmatprep.subr.bf16.mxu0 %v3765_v0 }
 0x713   :  { %v1011_v40 = vld [vmem:[#allocation2] sm:$0xff] }
 0x715   :  { %3180 = vmatpush3.bf16.msra.mxu0 %v3907_v25 }
 0x716   :  { %3181 = vmatprep.subr.bf16.mxu0 %v3765_v0 }
 0x719   :  { %3183 = vmatpush3.bf16.msra.mxu0 %v3912_v31 }
 0x71a   :  { %3184 = vmatprep.subr.bf16.mxu0 %v3765_v0 }
 0x71d   :  { %3186 = vmatpush3.bf16.msra.mxu0 %v3917_v37 }
 0x71e   :  { %3187 = vmatprep.subr.bf16.mxu0 %v3765_v0 }
 0x721   :  { %3189 = vmatpush3.bf16.msra.mxu0 %v3922_v43 }
 0x722   :  { %3190 = vmatprep.subr.bf16.mxu0 %v3765_v0 }
 0x725   :  { %3192 = vmatpush3.bf16.msra.mxu0 %v3927_v47 }
 0x726   :  { %3193 = vmatprep.subr.bf16.mxu0 %v3765_v0 }
 0x729   :  { %3195 = vmatpush3.bf16.msra.mxu0 %v3933_v53 }
 0x72a   :  { %3221 = vmatprep.subr.bf16.mxu0 %v3220_v5 }
 0x7df   :  { %v715_v11 = vpop.f32.mrb[6].mxu0 }
 0x7e0   :  { %v719_v12 = vadd.f32 %v715_v11, %v3981_v62  ;;  %v2545_v14 = vpop.f32.mrb[7].mxu0  ;;  %v1019_v11 = vld [vmem:[#allocation9 + $0xa8] sm:$0xff] }
 0x7e2   :  { %v1986_v15 = vmul.f32 -1.442695, %v719_v12  ;;  %3522 = vtanh.f32 %v719_v12  ;;  %v3228_v12 = vpack.c.bf16 %v1019_v11, %v1018_v10 }
 0x7e4   :  { %3524 = vpow2.f32 %v1986_v15  ;;  %v1114_v15 = vld [vmem:[#allocation10 + $0x80] sm:$0xff] }
 0x7ec   :  { %v3523_v16 = vpop.eup %3522 }
 0x7ed   :  { %729 = vrot.lane.b32.xlu1 %v3523_v16, %s3770_s26  ;;  %v1115_v16 = vld [vmem:[#allocation10 + $0x88] sm:$0xff] }
 0x7ee   :  { %v3525_v17 = vpop.eup %3524 }
 0x7ef   :  { %v723_v18 = vadd.f32 1.0, %v3525_v17  ;;  %v4107_v17 = vpack.c.bf16 %v1115_v16, %v1114_v15 }
 0x7f1   :  { %3526 = vrcp.f32 %v723_v18  ;;  %v1020_v18 = vld [vmem:[#allocation9 + $0xb0] sm:$0xff] }
 0x7fb   :  { %v3527_v20 = vpop.eup %3526 }
 0x7fc   :  { %727 = vrot.lane.b32.xlu0 %v3527_v20, %s3769_s25 }
 0x800   :  { %731 = vrot.lane.b32.xlu0 %v3527_v20, %s3768_s24 }
 0x85f   :  { %v730_v21 = vpop.permute.xlu1 %729 }
 0x860   :  { %v734_v23 = vmul.f32 %v3527_v20, %v730_v21  ;;  %v1021_v20 = vld [vmem:[#allocation9 + $0xb8] sm:$0xff] }
 0x861   :  { %v3232_v21 = vpack.c.bf16 %v1021_v20, %v1020_v18 }
 0x86e   :  { %v728_v22 = vpop.permute.xlu0 %727 }
 0x86f   :  { %v733_v24 = vmul.f32 %v728_v22, %v645_v7  ;;  %v1116_v22 = vld [vmem:[#allocation10 + $0x90] sm:$0xff] }
 0x871   :  { %v735_v26 = vadd.f32 %v734_v23, %v733_v24  ;;  %v1117_v23 = vld [vmem:[#allocation10 + $0x98] sm:$0xff] }
 0x872   :  { %v732_v28 = vpop.permute.xlu0 %731  ;;  %v4111_v24 = vpack.c.bf16 %v1117_v23, %v1116_v22 }
 0x873   :  { %3528 = vtanh.f32 %v735_v26 }
 0x87d   :  { %v3529_v27 = vpop.eup %3528 }
 0x87e   :  { %v737_v29 = vmul.f32 %v3529_v27, %v732_v28  ;;  %v1023_v27 = vld [vmem:[#allocation9 + $0xc8] sm:$0xff] }
 0x880   :  { %738 = vst [vmem:[#allocation2 + $0x8] sm:$0x3] %v737_v29  ;;  %2579 = vmatmul.mubr.f32.vlgmr.msra.gmra.mrb[6].mxu1 %v737_v29  ;;  %v1118_v29 = vld [vmem:[#allocation10 + $0xa0] sm:$0xff] }
 0x881   :  { %3198 = vmatpush3.bf16.msra.mxu1 %v3895_v13  ;;  %2648 = vmatprep.mubr.msk.f32.mxu1 %vm3766_vm0, %v3767_v1 }
 0x882   :  { %3199 = vmatprep.subr.bf16.mxu1 %v3765_v0 }
 0x885   :  { %3201 = vmatpush3.bf16.msra.mxu1 %v3900_v19 }
 0x886   :  { %3202 = vmatprep.subr.bf16.mxu1 %v3765_v0 }
 0x889   :  { %3204 = vmatpush3.bf16.msra.mxu1 %v3907_v25 }
 0x88a   :  { %3205 = vmatprep.subr.bf16.mxu1 %v3765_v0 }
 0x88d   :  { %3207 = vmatpush3.bf16.msra.mxu1 %v3912_v31 }
 0x88e   :  { %3208 = vmatprep.subr.bf16.mxu1 %v3765_v0 }
 0x891   :  { %3210 = vmatpush3.bf16.msra.mxu1 %v3917_v37 }
 0x892   :  { %3211 = vmatprep.subr.bf16.mxu1 %v3765_v0 }
 0x895   :  { %3213 = vmatpush3.bf16.msra.mxu1 %v3922_v43 }
 0x896   :  { %3214 = vmatprep.subr.bf16.mxu1 %v3765_v0 }
 0x899   :  { %3216 = vmatpush3.bf16.msra.mxu1 %v3927_v47 }
 0x89a   :  { %3217 = vmatprep.subr.bf16.mxu1 %v3765_v0 }
 0x89d   :  { %3219 = vmatpush3.bf16.msra.mxu1 %v3933_v53 }
 0x89e   :  { %3252 = vmatprep.subr.bf16.mxu1 %v3765_v0 }
 0x953   :  { %v805_v13 = vpop.f32.mrb[6].mxu1 }
 0x954   :  { %v809_v19 = vadd.f32 %v805_v13, %v3981_v62  ;;  %v2580_v25 = vpop.f32.mrb[7].mxu1  ;;  %v1119_v13 = vld [vmem:[#allocation10 + $0xa8] sm:$0xff] }
 0x955   :  { %v1024_v25 = vld [vmem:[#allocation9 + $0xd0] sm:$0xff] }
 0x956   :  { %v1987_v31 = vmul.f32 -1.442695, %v809_v19  ;;  %3530 = vtanh.f32 %v809_v19  ;;  %v4115_v19 = vpack.c.bf16 %v1119_v13, %v1118_v29 }
 0x958   :  { %3532 = vpow2.f32 %v1987_v31  ;;  %v1025_v31 = vld [vmem:[#allocation9 + $0xd8] sm:$0xff] }
 0x960   :  { %v3531_v37 = vpop.eup %3530 }
 0x961   :  { %819 = vrot.lane.b32.xlu0 %v3531_v37, %s3770_s26  ;;  %v3240_v37 = vpack.c.bf16 %v1025_v31, %v1024_v25 }
 0x962   :  { %v3533_v43 = vpop.eup %3532 }
 0x963   :  { %v813_v30 = vadd.f32 1.0, %v3533_v43 }
 0x965   :  { %3534 = vrcp.f32 %v813_v30  ;;  %v1120_v30 = vld [vmem:[#allocation10 + $0xb0] sm:$0xff] }
 0x96f   :  { %v3535_v47 = vpop.eup %3534 }
 0x970   :  { %817 = vrot.lane.b32.xlu1 %v3535_v47, %s3769_s25 }
 0x974   :  { %821 = vrot.lane.b32.xlu1 %v3535_v47, %s3768_s24 }
 0x9d3   :  { %v820_v53 = vpop.permute.xlu0 %819 }
 0x9d4   :  { %v824_v33 = vmul.f32 %v3535_v47, %v820_v53  ;;  %v1121_v47 = vld [vmem:[#allocation10 + $0xb8] sm:$0xff] }
 0x9d5   :  { %v4123_v53 = vpack.c.bf16 %v1121_v47, %v1120_v30 }
 0x9e2   :  { %v818_v32 = vpop.permute.xlu1 %817 }
 0x9e3   :  { %v823_v34 = vmul.f32 %v818_v32, %v735_v26  ;;  %v1022_v26 = vld [vmem:[#allocation9 + $0xc0] sm:$0xff] }
 0x9e4   :  { %v3236_v28 = vpack.c.bf16 %v1023_v27, %v1022_v26  ;;  %v1026_v32 = vld [vmem:[#allocation9 + $0xe0] sm:$0xff] }
 0x9e5   :  { %v825_v35 = vadd.f32 %v824_v33, %v823_v34  ;;  %v1027_v33 = vld [vmem:[#allocation9 + $0xe8] sm:$0xff] }
 0x9e6   :  { %v822_v38 = vpop.permute.xlu1 %821  ;;  %v3244_v34 = vpack.c.bf16 %v1027_v33, %v1026_v32 }
 0x9e7   :  { %3536 = vtanh.f32 %v825_v35 }
 0x9f1   :  { %v3537_v36 = vpop.eup %3536 }
 0x9f2   :  { %v827_v39 = vmul.f32 %v3537_v36, %v822_v38  ;;  %v1123_v36 = vld [vmem:[#allocation10 + $0xc8] sm:$0xff]  ;;  %v1028_v38 = vld [vmem:[#allocation9 + $0xf0] sm:$0xff] }
 0x9f4   :  { %828 = vst [vmem:[#allocation2 + $0xa] sm:$0x3] %v827_v39  ;;  %2614 = vmatmul.mubr.f32.vlgmr.msra.gmra.mrb[8].mxu0 %v827_v39 }
 0x9f5   :  { %2683 = vmatprep.mubr.f32.mxu0 %v1011_v40  ;;  %3223 = vmatpush3.bf16.msra.mxu0 %v3220_v5  ;;  %v1029_v40 = vld [vmem:[#allocation9 + $0xf8] sm:$0xff] }
 0x9f6   :  { %3225 = vmatprep.subr.bf16.mxu0 %v3224_v8 }
 0x9f9   :  { %3227 = vmatpush3.bf16.msra.mxu0 %v3224_v8 }
 0x9fa   :  { %3229 = vmatprep.subr.bf16.mxu0 %v3228_v12 }
 0x9fd   :  { %3231 = vmatpush3.bf16.msra.mxu0 %v3228_v12 }
 0x9fe   :  { %3233 = vmatprep.subr.bf16.mxu0 %v3232_v21 }
 0xa01   :  { %3235 = vmatpush3.bf16.msra.mxu0 %v3232_v21 }
 0xa02   :  { %3237 = vmatprep.subr.bf16.mxu0 %v3236_v28 }
 0xa05   :  { %3239 = vmatpush3.bf16.msra.mxu0 %v3236_v28 }
 0xa06   :  { %3241 = vmatprep.subr.bf16.mxu0 %v3240_v37 }
 0xa09   :  { %3243 = vmatpush3.bf16.msra.mxu0 %v3240_v37 }
 0xa0a   :  { %3245 = vmatprep.subr.bf16.mxu0 %v3244_v34 }
 0xa0d   :  { %3247 = vmatpush3.bf16.msra.mxu0 %v3244_v34 }
 0xac7   :  { %v895_v41 = vpop.f32.mrb[8].mxu0 }
 0xac8   :  { %v899_v42 = vadd.f32 %v895_v41, %v3981_v62  ;;  %v2615_v44 = vpop.f32.mrb[9].mxu0  ;;  %v1124_v41 = vld [vmem:[#allocation10 + $0xd0] sm:$0xff] }
 0xac9   :  { %v3248_v44 = vpack.c.bf16 %v1029_v40, %v1028_v38 }
 0xaca   :  { %v1988_v45 = vmul.f32 -1.442695, %v899_v42  ;;  %3538 = vtanh.f32 %v899_v42  ;;  %v1125_v42 = vld [vmem:[#allocation10 + $0xd8] sm:$0xff] }
 0xacb   :  { %3249 = vmatprep.subr.bf16.mxu0 %v3248_v44 }
 0xacc   :  { %3540 = vpow2.f32 %v1988_v45  ;;  %v4132_v45 = vpack.c.bf16 %v1125_v42, %v1124_v41  ;;  %3251 = vmatpush3.bf16.msra.mxu0 %v3248_v44 }
 0xacd   :  { %3276 = vmatprep.subr.bf16.mxu0 %v3765_v0 }
 0xad4   :  { %v3539_v46 = vpop.eup %3538 }
 0xad5   :  { %909 = vrot.lane.b32.xlu1 %v3539_v46, %s3770_s26  ;;  %v1126_v46 = vld [vmem:[#allocation10 + $0xe0] sm:$0xff] }
 0xad6   :  { %v3541_v48 = vpop.eup %3540 }
 0xad7   :  { %v903_v49 = vadd.f32 1.0, %v3541_v48  ;;  %v1127_v48 = vld [vmem:[#allocation10 + $0xe8] sm:$0xff] }
 0xad9   :  { %3542 = vrcp.f32 %v903_v49  ;;  %v1128_v49 = vld [vmem:[#allocation10 + $0xf0] sm:$0xff] }
 0xae3   :  { %v3543_v50 = vpop.eup %3542 }
 0xae4   :  { %907 = vrot.lane.b32.xlu0 %v3543_v50, %s3769_s25 }
 0xae8   :  { %911 = vrot.lane.b32.xlu0 %v3543_v50, %s3768_s24 }
 0xb47   :  { %v910_v51 = vpop.permute.xlu1 %909 }
 0xb48   :  { %v914_v54 = vmul.f32 %v3543_v50, %v910_v51  ;;  %v4138_v50 = vpack.c.bf16 %v1127_v48, %v1126_v46  ;;  %v1129_v51 = vld [vmem:[#allocation10 + $0xf8] sm:$0xff] }
 0xb56   :  { %v908_v52 = vpop.permute.xlu0 %907 }
 0xb57   :  { %v913_v55 = vmul.f32 %v908_v52, %v825_v35  ;;  %v1122_v35 = vld [vmem:[#allocation10 + $0xc0] sm:$0xff]  ;;  %v4141_v52 = vpack.c.bf16 %v1129_v51, %v1128_v49 }
 0xb58   :  { %v4129_v39 = vpack.c.bf16 %v1123_v36, %v1122_v35 }
 0xb59   :  { %v4100_v56 = vadd.f32 %v914_v54, %v913_v55 }
 0xb5a   :  { %v912_v58 = vpop.permute.xlu0 %911 }
 0xb5b   :  { %3544 = vtanh.f32 %v4100_v56 }
 0xb65   :  { %v3545_v57 = vpop.eup %3544 }
 0xb66   :  { %v917_v59 = vmul.f32 %v3545_v57, %v912_v58 }
 0xb68   :  { %918 = vst [vmem:[#allocation2 + $0xc] sm:$0x3] %v917_v59  ;;  %2649 = vmatmul.mubr.f32.vlgmr.msra.gmra.mrb[8].mxu1 %v917_v59 }
 0xb69   :  { %2718 = vmatprep.mubr.msk.f32.mxu1 %vm3766_vm0, %v3767_v1  ;;  %3254 = vmatpush3.bf16.msra.mxu1 %v4107_v17 }
 0xb6a   :  { %3255 = vmatprep.subr.bf16.mxu1 %v3765_v0 }
 0xb6d   :  { %3257 = vmatpush3.bf16.msra.mxu1 %v4111_v24 }
 0xb6e   :  { %3258 = vmatprep.subr.bf16.mxu1 %v3765_v0 }
 0xb71   :  { %3260 = vmatpush3.bf16.msra.mxu1 %v4115_v19 }
 0xb72   :  { %3261 = vmatprep.subr.bf16.mxu1 %v3765_v0 }
 0xb75   :  { %3263 = vmatpush3.bf16.msra.mxu1 %v4123_v53 }
 0xb76   :  { %3264 = vmatprep.subr.bf16.mxu1 %v3765_v0 }
 0xb79   :  { %3266 = vmatpush3.bf16.msra.mxu1 %v4129_v39 }
 0xb7a   :  { %3267 = vmatprep.subr.bf16.mxu1 %v3765_v0 }
 0xb7d   :  { %3269 = vmatpush3.bf16.msra.mxu1 %v4132_v45 }
 0xb7e   :  { %3270 = vmatprep.subr.bf16.mxu1 %v3765_v0 }
 0xb81   :  { %3272 = vmatpush3.bf16.msra.mxu1 %v4138_v50 }
 0xb82   :  { %3273 = vmatprep.subr.bf16.mxu1 %v3765_v0 }
 0xb85   :  { %3275 = vmatpush3.bf16.msra.mxu1 %v4141_v52 }
 0xb86   :  { %3300 = vmatprep.subr.bf16.mxu1 %v3765_v0 }
 0xb88   :  { %2719 = vmatmul.mubr.f32.vlgmr.msra.gmra.mrb[10].mxu1 %v3767_v1 }
 0xb89   :  { %3302 = vmatpush3.bf16.msra.mxu1 %v4107_v17  ;;  %2788 = vmatprep.mubr.msk.f32.mxu1 %vm3766_vm0, %v3767_v1 }
 0xb8a   :  { %3303 = vmatprep.subr.bf16.mxu1 %v3765_v0 }
 0xb8d   :  { %3305 = vmatpush3.bf16.msra.mxu1 %v4111_v24 }
 0xb8e   :  { %3306 = vmatprep.subr.bf16.mxu1 %v3765_v0 }
 0xb91   :  { %3308 = vmatpush3.bf16.msra.mxu1 %v4115_v19 }
 0xb92   :  { %3309 = vmatprep.subr.bf16.mxu1 %v3765_v0 }
 0xb95   :  { %3311 = vmatpush3.bf16.msra.mxu1 %v4123_v53 }
 0xb96   :  { %3312 = vmatprep.subr.bf16.mxu1 %v3765_v0 }
 0xb99   :  { %3314 = vmatpush3.bf16.msra.mxu1 %v4129_v39 }
 0xb9a   :  { %3315 = vmatprep.subr.bf16.mxu1 %v3765_v0 }
 0xb9d   :  { %3317 = vmatpush3.bf16.msra.mxu1 %v4132_v45 }
 0xb9e   :  { %3318 = vmatprep.subr.bf16.mxu1 %v3765_v0 }
 0xba1   :  { %3320 = vmatpush3.bf16.msra.mxu1 %v4138_v50 }
 0xba2   :  { %3321 = vmatprep.subr.bf16.mxu1 %v3765_v0 }
 0xba5   :  { %3323 = vmatpush3.bf16.msra.mxu1 %v4141_v52 }
 0xba6   :  { %3348 = vmatprep.subr.bf16.mxu1 %v3765_v0 }
 0xc3b   :  { %v985_v60 = vpop.f32.mrb[8].mxu1 }
 0xc3c   :  { %v989_v61 = vadd.f32 %v985_v60, %v3981_v62  ;;  %v2650_v63 = vpop.f32.mrb[9].mxu1 }
 0xc3e   :  { %v1989_v7 = vmul.f32 -1.442695, %v989_v61  ;;  %3546 = vtanh.f32 %v989_v61 }
 0xc40   :  { %3548 = vpow2.f32 %v1989_v7 }
 0xc48   :  { %v3547_v9 = vpop.eup %3546 }
 0xc49   :  { %999 = vrot.lane.b32.xlu0 %v3547_v9, %s3770_s26 }
 0xc4a   :  { %v3549_v62 = vpop.eup %3548 }
 0xc4b   :  { %v993_v14 = vadd.f32 1.0, %v3549_v62 }
 0xc4d   :  { %3550 = vrcp.f32 %v993_v14 }
 0xc57   :  { %v4117_v43 = vpop.eup %3550 }
 0xc58   :  { %997 = vrot.lane.b32.xlu1 %v4117_v43, %s3769_s25 }
 0xc5c   :  { %1001 = vrot.lane.b32.xlu1 %v4117_v43, %s3768_s24 }
 0xcbb   :  { %v1000_v54 = vpop.permute.xlu0 %999 }
 0xcbc   :  { %v1004_v57 = vmul.f32 %v4117_v43, %v1000_v54 }
 0xcca   :  { %v998_v55 = vpop.permute.xlu1 %997 }
 0xccb   :  { %v1003_v58 = vmul.f32 %v998_v55, %v4100_v56  ;;  %v1197_v56 = vpop.f32.mrb[10].mxu1 }
 0xccc   :  { %v2720_v3 = vpop.f32.mrb[11].mxu1 }
 0xccd   :  { %v1005_v59 = vadd.f32 %v1004_v57, %v1003_v58 }
 0xcce   :  { %v1002_v61 = vpop.permute.xlu1 %1001 }
 0xccf   :  { %3552 = vtanh.f32 %v1005_v59 }
 0xcd9   :  { %v3553_v60 = vpop.eup %3552 }
 0xcda   :  { %v1007_v63 = vmul.f32 %v3553_v60, %v1002_v61 }
 0xcdc   :  { %1008 = vst [vmem:[#allocation2 + $0xe] sm:$0x3] %v1007_v63 }
 0xce3   :  { %v1012_v2 = vld [vmem:[#allocation2 + $0x8] sm:$0xff] }
 0xce4   :  { %2684 = vmatmul.mubr.f32.vlgmr.msra.gmra.mrb[10].mxu0 %v1012_v2 }
 0xce5   :  { %3278 = vmatpush3.bf16.msra.mxu0 %v4107_v17  ;;  %2753 = vmatprep.mubr.msk.f32.mxu0 %vm3766_vm0, %v3767_v1 }
 0xce6   :  { %3279 = vmatprep.subr.bf16.mxu0 %v3765_v0 }
 0xce9   :  { %3281 = vmatpush3.bf16.msra.mxu0 %v4111_v24 }
 0xcea   :  { %3282 = vmatprep.subr.bf16.mxu0 %v3765_v0 }
 0xced   :  { %3284 = vmatpush3.bf16.msra.mxu0 %v4115_v19 }
 0xcee   :  { %3285 = vmatprep.subr.bf16.mxu0 %v3765_v0 }
 0xcf1   :  { %3287 = vmatpush3.bf16.msra.mxu0 %v4123_v53 }
 0xcf2   :  { %3288 = vmatprep.subr.bf16.mxu0 %v3765_v0 }
 0xcf5   :  { %3290 = vmatpush3.bf16.msra.mxu0 %v4129_v39 }
 0xcf6   :  { %3291 = vmatprep.subr.bf16.mxu0 %v3765_v0 }
 0xcf9   :  { %3293 = vmatpush3.bf16.msra.mxu0 %v4132_v45 }
 0xcfa   :  { %3294 = vmatprep.subr.bf16.mxu0 %v3765_v0 }
 0xcfd   :  { %3296 = vmatpush3.bf16.msra.mxu0 %v4138_v50 }
 0xcfe   :  { %3297 = vmatprep.subr.bf16.mxu0 %v3765_v0 }
 0xd01   :  { %3299 = vmatpush3.bf16.msra.mxu0 %v4141_v52 }
 0xd02   :  { %3324 = vmatprep.subr.bf16.mxu0 %v3765_v0 }
 0xdb7   :  { %v2685_v5 = vpop.f32.mrb[10].mxu0 }
 0xdb8   :  { %v1108_v6 = vadd.f32 %v2685_v5, %v1991_v4  ;;  %v1102_v7 = vpop.f32.mrb[11].mxu0 }
 0xdb9   :  { %v1103_v8 = vadd.f32 %v1991_v4, %v1102_v7 }
 0xdba   :  { %1112 = vst [vmem:[#allocation3 + $0x8] sm:$0xff] %v1108_v6 }
 0xdbb   :  { %1111 = vst [vmem:[#allocation3] sm:$0xff] %v1103_v8 }
 0xdc2   :  { %v1130_v9 = vld [vmem:[#allocation3] sm:$0x3]  ;;  %v1221_v28 = vld [vmem:[#allocation3 + $0x2] sm:$0x3]  ;;  %v1312_v42 = vld [vmem:[#allocation3 + $0x4] sm:$0x3] }
 0xdc3   :  { %v1201_v10 = vadd.f32 %v1197_v56, %v1130_v9  ;;  %v1403_v4 = vld [vmem:[#allocation3 + $0x6] sm:$0x3] }
 0xdc5   :  { %v1992_v11 = vmul.f32 -1.442695, %v1201_v10  ;;  %3554 = vtanh.f32 %v1201_v10 }
 0xdc7   :  { %3556 = vpow2.f32 %v1992_v11 }
 0xdcf   :  { %v3555_v62 = vpop.eup %3554 }
 0xdd0   :  { %1211 = vrot.lane.b32.xlu1 %v3555_v62, %s3770_s26 }
 0xdd1   :  { %v3557_v12 = vpop.eup %3556 }
 0xdd2   :  { %v1205_v14 = vadd.f32 1.0, %v3557_v12 }
 0xdd4   :  { %3558 = vrcp.f32 %v1205_v14 }
 0xdde   :  { %v3559_v15 = vpop.eup %3558 }
 0xddf   :  { %1209 = vrot.lane.b32.xlu0 %v3559_v15, %s3769_s25 }
 0xde3   :  { %1213 = vrot.lane.b32.xlu0 %v3559_v15, %s3768_s24 }
 0xe42   :  { %v1212_v16 = vpop.permute.xlu1 %1211 }
 0xe43   :  { %v1216_v20 = vmul.f32 %v3559_v15, %v1212_v16 }
 0xe51   :  { %v1210_v18 = vpop.permute.xlu0 %1209 }
 0xe52   :  { %v1215_v21 = vmul.f32 0.0, %v1210_v18 }
 0xe54   :  { %v1217_v22 = vadd.f32 %v1216_v20, %v1215_v21 }
 0xe55   :  { %v1214_v26 = vpop.permute.xlu0 %1213 }
 0xe56   :  { %3560 = vtanh.f32 %v1217_v22 }
 0xe60   :  { %v3561_v23 = vpop.eup %3560 }
 0xe61   :  { %v1219_v27 = vmul.f32 %v3561_v23, %v1214_v26  ;;  %v1494_v23 = vld [vmem:[#allocation3 + $0x8] sm:$0x3] }
 0xe63   :  { %1220 = vst [vmem:[#allocation2] sm:$0x3] %v1219_v27  ;;  %2754 = vmatmul.mubr.f32.vlgmr.msra.gmra.mrb[12].mxu0 %v1219_v27 }
 0xe64   :  { %3326 = vmatpush3.bf16.msra.mxu0 %v4107_v17  ;;  %2823 = vmatprep.mubr.msk.f32.mxu0 %vm3766_vm0, %v3767_v1 }
 0xe65   :  { %3327 = vmatprep.subr.bf16.mxu0 %v3765_v0 }
 0xe68   :  { %3329 = vmatpush3.bf16.msra.mxu0 %v4111_v24 }
 0xe69   :  { %3330 = vmatprep.subr.bf16.mxu0 %v3765_v0 }
 0xe6c   :  { %3332 = vmatpush3.bf16.msra.mxu0 %v4115_v19 }
 0xe6d   :  { %3333 = vmatprep.subr.bf16.mxu0 %v3765_v0 }
 0xe70   :  { %3335 = vmatpush3.bf16.msra.mxu0 %v4123_v53 }
 0xe71   :  { %3336 = vmatprep.subr.bf16.mxu0 %v3765_v0 }
 0xe74   :  { %3338 = vmatpush3.bf16.msra.mxu0 %v4129_v39 }
 0xe75   :  { %3339 = vmatprep.subr.bf16.mxu0 %v3765_v0 }
 0xe78   :  { %3341 = vmatpush3.bf16.msra.mxu0 %v4132_v45 }
 0xe79   :  { %3342 = vmatprep.subr.bf16.mxu0 %v3765_v0 }
 0xe7c   :  { %3344 = vmatpush3.bf16.msra.mxu0 %v4138_v50 }
 0xe7d   :  { %3345 = vmatprep.subr.bf16.mxu0 %v3765_v0 }
 0xe80   :  { %3347 = vmatpush3.bf16.msra.mxu0 %v4141_v52 }
 0xe81   :  { %3372 = vmatprep.subr.bf16.mxu0 %v3765_v0 }
 0xf36   :  { %v1288_v29 = vpop.f32.mrb[12].mxu0 }
 0xf37   :  { %v1292_v13 = vadd.f32 %v1288_v29, %v1221_v28  ;;  %v2755_v25 = vpop.f32.mrb[13].mxu0 }
 0xf39   :  { %v1993_v31 = vmul.f32 -1.442695, %v1292_v13  ;;  %3562 = vtanh.f32 %v1292_v13 }
 0xf3b   :  { %3564 = vpow2.f32 %v1993_v31 }
 0xf43   :  { %v3563_v37 = vpop.eup %3562 }
 0xf44   :  { %1302 = vrot.lane.b32.xlu0 %v3563_v37, %s3770_s26 }
 0xf45   :  { %v3565_v43 = vpop.eup %3564 }
 0xf46   :  { %v1296_v30 = vadd.f32 1.0, %v3565_v43 }
 0xf48   :  { %3566 = vrcp.f32 %v1296_v30 }
 0xf52   :  { %v3567_v47 = vpop.eup %3566 }
 0xf53   :  { %1300 = vrot.lane.b32.xlu1 %v3567_v47, %s3769_s25 }
 0xf57   :  { %1304 = vrot.lane.b32.xlu1 %v3567_v47, %s3768_s24 }
 0xfb6   :  { %v1303_v32 = vpop.permute.xlu0 %1302 }
 0xfb7   :  { %v1307_v34 = vmul.f32 %v3567_v47, %v1303_v32 }
 0xfc5   :  { %v1301_v33 = vpop.permute.xlu1 %1300 }
 0xfc6   :  { %v1306_v35 = vmul.f32 %v1301_v33, %v1217_v22 }
 0xfc8   :  { %v1308_v36 = vadd.f32 %v1307_v34, %v1306_v35 }
 0xfc9   :  { %v1305_v40 = vpop.permute.xlu1 %1304 }
 0xfca   :  { %3568 = vtanh.f32 %v1308_v36 }
 0xfd4   :  { %v3569_v38 = vpop.eup %3568 }
 0xfd5   :  { %v1310_v41 = vmul.f32 %v3569_v38, %v1305_v40 }
 0xfd7   :  { %1311 = vst [vmem:[#allocation2 + $0x2] sm:$0x3] %v1310_v41  ;;  %2789 = vmatmul.mubr.f32.vlgmr.msra.gmra.mrb[12].mxu1 %v1310_v41 }
 0xfd8   :  { %3350 = vmatpush3.bf16.msra.mxu1 %v4107_v17  ;;  %2858 = vmatprep.mubr.msk.f32.mxu1 %vm3766_vm0, %v3767_v1 }
 0xfd9   :  { %3351 = vmatprep.subr.bf16.mxu1 %v3765_v0 }
 0xfdc   :  { %3353 = vmatpush3.bf16.msra.mxu1 %v4111_v24 }
 0xfdd   :  { %3354 = vmatprep.subr.bf16.mxu1 %v3765_v0 }
 0xfe0   :  { %3356 = vmatpush3.bf16.msra.mxu1 %v4115_v19 }
 0xfe1   :  { %3357 = vmatprep.subr.bf16.mxu1 %v3765_v0 }
 0xfe4   :  { %3359 = vmatpush3.bf16.msra.mxu1 %v4123_v53 }
 0xfe5   :  { %3360 = vmatprep.subr.bf16.mxu1 %v3765_v0 }
 0xfe8   :  { %3362 = vmatpush3.bf16.msra.mxu1 %v4129_v39 }
 0xfe9   :  { %3363 = vmatprep.subr.bf16.mxu1 %v3765_v0 }
 0xfec   :  { %3365 = vmatpush3.bf16.msra.mxu1 %v4132_v45 }
 0xfed   :  { %3366 = vmatprep.subr.bf16.mxu1 %v3765_v0 }
 0xff0   :  { %3368 = vmatpush3.bf16.msra.mxu1 %v4138_v50 }
 0xff1   :  { %3369 = vmatprep.subr.bf16.mxu1 %v3765_v0 }
 0xff4   :  { %3371 = vmatpush3.bf16.msra.mxu1 %v4141_v52 }
 0xff5   :  { %3396 = vmatprep.subr.bf16.mxu1 %v3765_v0 }
0x10aa   :  { %v1379_v44 = vpop.f32.mrb[12].mxu1 }
0x10ab   :  { %v1383_v46 = vadd.f32 %v1379_v44, %v1312_v42  ;;  %v2790_v48 = vpop.f32.mrb[13].mxu1 }
0x10ad   :  { %v1994_v49 = vmul.f32 -1.442695, %v1383_v46  ;;  %3570 = vtanh.f32 %v1383_v46 }
0x10af   :  { %3572 = vpow2.f32 %v1994_v49 }
0x10b7   :  { %v3571_v51 = vpop.eup %3570 }
0x10b8   :  { %1393 = vrot.lane.b32.xlu1 %v3571_v51, %s3770_s26  ;;  %v1676_v51 = vld [vmem:[#allocation3 + $0xc] sm:$0x3] }
0x10b9   :  { %v3573_v54 = vpop.eup %3572 }
0x10ba   :  { %v1387_v55 = vadd.f32 1.0, %v3573_v54 }
0x10bc   :  { %3574 = vrcp.f32 %v1387_v55 }
0x10c6   :  { %v3575_v57 = vpop.eup %3574 }
0x10c7   :  { %1391 = vrot.lane.b32.xlu0 %v3575_v57, %s3769_s25 }
0x10cb   :  { %1395 = vrot.lane.b32.xlu0 %v3575_v57, %s3768_s24 }
0x112a   :  { %v1394_v58 = vpop.permute.xlu1 %1393 }
0x112b   :  { %v1398_v60 = vmul.f32 %v3575_v57, %v1394_v58 }
0x1139   :  { %v1392_v59 = vpop.permute.xlu0 %1391 }
0x113a   :  { %v1397_v61 = vmul.f32 %v1392_v59, %v1308_v36 }
0x113c   :  { %v1399_v63 = vadd.f32 %v1398_v60, %v1397_v61 }
0x113d   :  { %v1396_v56 = vpop.permute.xlu0 %1395 }
0x113e   :  { %3576 = vtanh.f32 %v1399_v63 }
0x1148   :  { %v3577_v2 = vpop.eup %3576 }
0x1149   :  { %v1401_v3 = vmul.f32 %v3577_v2, %v1396_v56 }
0x114b   :  { %1402 = vst [vmem:[#allocation2 + $0x4] sm:$0x3] %v1401_v3  ;;  %2824 = vmatmul.mubr.f32.vlgmr.msra.gmra.mrb[14].mxu0 %v1401_v3 }
0x114c   :  { %3374 = vmatpush3.bf16.msra.mxu0 %v4107_v17  ;;  %2893 = vmatprep.mubr.msk.f32.mxu0 %vm3766_vm0, %v3767_v1 }
0x114d   :  { %3375 = vmatprep.subr.bf16.mxu0 %v3765_v0 }
0x1150   :  { %3377 = vmatpush3.bf16.msra.mxu0 %v4111_v24 }
0x1151   :  { %3378 = vmatprep.subr.bf16.mxu0 %v3765_v0 }
0x1154   :  { %3380 = vmatpush3.bf16.msra.mxu0 %v4115_v19 }
0x1155   :  { %3381 = vmatprep.subr.bf16.mxu0 %v3765_v0 }
0x1158   :  { %3383 = vmatpush3.bf16.msra.mxu0 %v4123_v53 }
0x1159   :  { %3384 = vmatprep.subr.bf16.mxu0 %v3765_v0 }
0x115c   :  { %3386 = vmatpush3.bf16.msra.mxu0 %v4129_v39 }
0x115d   :  { %3387 = vmatprep.subr.bf16.mxu0 %v3765_v0 }
0x1160   :  { %3389 = vmatpush3.bf16.msra.mxu0 %v4132_v45 }
0x1161   :  { %3390 = vmatprep.subr.bf16.mxu0 %v3765_v0 }
0x1164   :  { %3392 = vmatpush3.bf16.msra.mxu0 %v4138_v50 }
0x1165   :  { %3393 = vmatprep.subr.bf16.mxu0 %v3765_v0 }
0x1168   :  { %3395 = vmatpush3.bf16.msra.mxu0 %v4141_v52 }
0x1169   :  { %3420 = vmatprep.subr.bf16.mxu0 %v3765_v0 }
0x121e   :  { %v1470_v5 = vpop.f32.mrb[14].mxu0 }
0x121f   :  { %v1474_v6 = vadd.f32 %v1470_v5, %v1403_v4  ;;  %v2825_v7 = vpop.f32.mrb[15].mxu0 }
0x1221   :  { %v1995_v8 = vmul.f32 -1.442695, %v1474_v6  ;;  %3578 = vtanh.f32 %v1474_v6 }
0x1223   :  { %3580 = vpow2.f32 %v1995_v8 }
0x122b   :  { %v3579_v9 = vpop.eup %3578 }
0x122c   :  { %1484 = vrot.lane.b32.xlu0 %v3579_v9, %s3770_s26  ;;  %v1767_v9 = vld [vmem:[#allocation3 + $0xe] sm:$0x3] }
0x122d   :  { %v3581_v10 = vpop.eup %3580 }
0x122e   :  { %v1478_v11 = vadd.f32 1.0, %v3581_v10 }
0x1230   :  { %3582 = vrcp.f32 %v1478_v11 }
0x123a   :  { %v3583_v62 = vpop.eup %3582 }
0x123b   :  { %1482 = vrot.lane.b32.xlu1 %v3583_v62, %s3769_s25 }
0x123f   :  { %1486 = vrot.lane.b32.xlu1 %v3583_v62, %s3768_s24 }
0x129e   :  { %v1485_v12 = vpop.permute.xlu0 %1484 }
0x129f   :  { %v1489_v15 = vmul.f32 %v3583_v62, %v1485_v12  ;;  %v1860_v12 = vld [vmem:[#allocation12] sm:$0xff] }
0x12ad   :  { %v1483_v14 = vpop.permute.xlu1 %1482 }
0x12ae   :  { %v1488_v16 = vmul.f32 %v1483_v14, %v1399_v63  ;;  %v1861_v14 = vld [vmem:[#allocation12 + $0x8] sm:$0xff] }
0x12b0   :  { %v1490_v18 = vadd.f32 %v1489_v15, %v1488_v16  ;;  %v1862_v15 = vld [vmem:[#allocation12 + $0x10] sm:$0xff]  ;;  %v3444_v16 = vpack.c.bf16 %v1861_v14, %v1860_v12 }
0x12b1   :  { %v1487_v21 = vpop.permute.xlu1 %1486 }
0x12b2   :  { %3584 = vtanh.f32 %v1490_v18 }
0x12bc   :  { %v3585_v20 = vpop.eup %3584 }
0x12bd   :  { %v1492_v22 = vmul.f32 %v3585_v20, %v1487_v21 }
0x12bf   :  { %1493 = vst [vmem:[#allocation2 + $0x6] sm:$0x3] %v1492_v22  ;;  %2859 = vmatmul.mubr.f32.vlgmr.msra.gmra.mrb[14].mxu1 %v1492_v22 }
0x12c0   :  { %3398 = vmatpush3.bf16.msra.mxu1 %v4107_v17  ;;  %2928 = vmatprep.mubr.msk.f32.mxu1 %vm3766_vm0, %v3767_v1 }
0x12c1   :  { %3399 = vmatprep.subr.bf16.mxu1 %v3765_v0 }
0x12c4   :  { %3401 = vmatpush3.bf16.msra.mxu1 %v4111_v24 }
0x12c5   :  { %3402 = vmatprep.subr.bf16.mxu1 %v3765_v0 }
0x12c6   :  { %v1858_v49 = vld [vmem:[#allocation2] sm:$0xff] }
0x12c8   :  { %3404 = vmatpush3.bf16.msra.mxu1 %v4115_v19 }
0x12c9   :  { %3405 = vmatprep.subr.bf16.mxu1 %v3765_v0 }
0x12cc   :  { %3407 = vmatpush3.bf16.msra.mxu1 %v4123_v53 }
0x12cd   :  { %3408 = vmatprep.subr.bf16.mxu1 %v3765_v0 }
0x12d0   :  { %3410 = vmatpush3.bf16.msra.mxu1 %v4129_v39 }
0x12d1   :  { %3411 = vmatprep.subr.bf16.mxu1 %v3765_v0 }
0x12d4   :  { %3413 = vmatpush3.bf16.msra.mxu1 %v4132_v45 }
0x12d5   :  { %3414 = vmatprep.subr.bf16.mxu1 %v3765_v0 }
0x12d8   :  { %3416 = vmatpush3.bf16.msra.mxu1 %v4138_v50 }
0x12d9   :  { %3417 = vmatprep.subr.bf16.mxu1 %v3765_v0 }
0x12dc   :  { %3419 = vmatpush3.bf16.msra.mxu1 %v4141_v52 }
0x12dd   :  { %3445 = vmatprep.subr.bf16.mxu1 %v3444_v16 }
0x1392   :  { %v1561_v26 = vpop.f32.mrb[14].mxu1 }
0x1393   :  { %v1565_v27 = vadd.f32 %v1561_v26, %v1494_v23  ;;  %v2860_v28 = vpop.f32.mrb[15].mxu1 }
0x1394   :  { %v1865_v28 = vld [vmem:[#allocation12 + $0x28] sm:$0xff] }
0x1395   :  { %v1996_v29 = vmul.f32 -1.442695, %v1565_v27  ;;  %3586 = vtanh.f32 %v1565_v27  ;;  %v1864_v27 = vld [vmem:[#allocation12 + $0x20] sm:$0xff] }
0x1397   :  { %3588 = vpow2.f32 %v1996_v29  ;;  %v3452_v29 = vpack.c.bf16 %v1865_v28, %v1864_v27 }
0x139f   :  { %v3587_v13 = vpop.eup %3586 }
0x13a0   :  { %1575 = vrot.lane.b32.xlu1 %v3587_v13, %s3770_s26  ;;  %v1866_v13 = vld [vmem:[#allocation12 + $0x30] sm:$0xff] }
0x13a1   :  { %v3589_v25 = vpop.eup %3588 }
0x13a2   :  { %v1569_v31 = vadd.f32 1.0, %v3589_v25  ;;  %v1867_v25 = vld [vmem:[#allocation12 + $0x38] sm:$0xff] }
0x13a4   :  { %3590 = vrcp.f32 %v1569_v31  ;;  %v3456_v31 = vpack.c.bf16 %v1867_v25, %v1866_v13 }
0x13ae   :  { %v3591_v37 = vpop.eup %3590 }
0x13af   :  { %1573 = vrot.lane.b32.xlu0 %v3591_v37, %s3769_s25 }
0x13b3   :  { %1577 = vrot.lane.b32.xlu0 %v3591_v37, %s3768_s24 }
0x1412   :  { %v1576_v43 = vpop.permute.xlu1 %1575 }
0x1413   :  { %v1580_v47 = vmul.f32 %v3591_v37, %v1576_v43  ;;  %v1868_v37 = vld [vmem:[#allocation12 + $0x40] sm:$0xff]  ;;  %v1869_v43 = vld [vmem:[#allocation12 + $0x48] sm:$0xff] }
0x1421   :  { %v1574_v30 = vpop.permute.xlu0 %1573 }
0x1422   :  { %v1579_v32 = vmul.f32 %v1574_v30, %v1490_v18  ;;  %v1863_v18 = vld [vmem:[#allocation12 + $0x18] sm:$0xff]  ;;  %v3460_v30 = vpack.c.bf16 %v1869_v43, %v1868_v37 }
0x1423   :  { %v3448_v21 = vpack.c.bf16 %v1863_v18, %v1862_v15 }
0x1424   :  { %v1581_v33 = vadd.f32 %v1580_v47, %v1579_v32  ;;  %v1870_v32 = vld [vmem:[#allocation12 + $0x50] sm:$0xff] }
0x1425   :  { %v1578_v35 = vpop.permute.xlu0 %1577 }
0x1426   :  { %3592 = vtanh.f32 %v1581_v33 }
0x1430   :  { %v3593_v34 = vpop.eup %3592 }
0x1431   :  { %v1583_v36 = vmul.f32 %v3593_v34, %v1578_v35  ;;  %v1872_v35 = vld [vmem:[#allocation12 + $0x60] sm:$0xff] }
0x1433   :  { %1584 = vst [vmem:[#allocation2 + $0x8] sm:$0x3] %v1583_v36  ;;  %2894 = vmatmul.mubr.f32.vlgmr.msra.gmra.mrb[16].mxu0 %v1583_v36  ;;  %v1873_v36 = vld [vmem:[#allocation12 + $0x68] sm:$0xff] }
0x1434   :  { %3422 = vmatpush3.bf16.msra.mxu0 %v4107_v17  ;;  %2963 = vmatprep.mubr.msk.f32.mxu0 %vm3766_vm0, %v3767_v1  ;;  %v1585_v1 = vld [vmem:[#allocation3 + $0xa] sm:$0x3] }
0x1435   :  { %3423 = vmatprep.subr.bf16.mxu0 %v3765_v0 }
0x1438   :  { %3425 = vmatpush3.bf16.msra.mxu0 %v4111_v24 }
0x1439   :  { %3426 = vmatprep.subr.bf16.mxu0 %v3765_v0 }
0x143c   :  { %3428 = vmatpush3.bf16.msra.mxu0 %v4115_v19 }
0x143d   :  { %3429 = vmatprep.subr.bf16.mxu0 %v3765_v0 }
0x1440   :  { %3431 = vmatpush3.bf16.msra.mxu0 %v4123_v53 }
0x1441   :  { %3432 = vmatprep.subr.bf16.mxu0 %v3765_v0 }
0x1444   :  { %3434 = vmatpush3.bf16.msra.mxu0 %v4129_v39 }
0x1445   :  { %3435 = vmatprep.subr.bf16.mxu0 %v3765_v0 }
0x1448   :  { %3437 = vmatpush3.bf16.msra.mxu0 %v4132_v45 }
0x1449   :  { %3438 = vmatprep.subr.bf16.mxu0 %v3765_v0 }
0x144c   :  { %3440 = vmatpush3.bf16.msra.mxu0 %v4138_v50 }
0x144d   :  { %3441 = vmatprep.subr.bf16.mxu0 %v3765_v0 }
0x1450   :  { %3443 = vmatpush3.bf16.msra.mxu0 %v4141_v52 }
0x1506   :  { %v1652_v17 = vpop.f32.mrb[16].mxu0 }
0x1507   :  { %v1656_v24 = vadd.f32 %v1652_v17, %v1585_v1  ;;  %v2895_v19 = vpop.f32.mrb[17].mxu0  ;;  %v3468_v1 = vpack.c.bf16 %v1873_v36, %v1872_v35  ;;  %v1874_v17 = vld [vmem:[#allocation12 + $0x70] sm:$0xff] }
0x1509   :  { %v1997_v53 = vmul.f32 -1.442695, %v1656_v24  ;;  %3594 = vtanh.f32 %v1656_v24  ;;  %v1875_v24 = vld [vmem:[#allocation12 + $0x78] sm:$0xff] }
0x150a   :  { %v3472_v19 = vpack.c.bf16 %v1875_v24, %v1874_v17 }
0x150b   :  { %3596 = vpow2.f32 %v1997_v53 }
0x1513   :  { %v3595_v39 = vpop.eup %3594 }
0x1514   :  { %1666 = vrot.lane.b32.xlu0 %v3595_v39, %s3770_s26 }
0x1515   :  { %v3597_v38 = vpop.eup %3596 }
0x1516   :  { %v1660_v45 = vadd.f32 1.0, %v3597_v38 }
0x1518   :  { %3598 = vrcp.f32 %v1660_v45 }
0x1522   :  { %v3599_v40 = vpop.eup %3598 }
0x1523   :  { %1664 = vrot.lane.b32.xlu1 %v3599_v40, %s3769_s25 }
0x1527   :  { %1668 = vrot.lane.b32.xlu1 %v3599_v40, %s3768_s24 }
0x1586   :  { %v1667_v0 = vpop.permute.xlu0 %1666 }
0x1587   :  { %v1671_v52 = vmul.f32 %v3599_v40, %v1667_v0 }
0x1595   :  { %v1665_v50 = vpop.permute.xlu1 %1664 }
0x1596   :  { %v1670_v41 = vmul.f32 %v1665_v50, %v1581_v33  ;;  %v1871_v33 = vld [vmem:[#allocation12 + $0x58] sm:$0xff] }
0x1597   :  { %v3464_v34 = vpack.c.bf16 %v1871_v33, %v1870_v32 }
0x1598   :  { %v1672_v42 = vadd.f32 %v1671_v52, %v1670_v41 }
0x1599   :  { %v1669_v46 = vpop.permute.xlu1 %1668 }
0x159a   :  { %3600 = vtanh.f32 %v1672_v42 }
0x15a4   :  { %v3601_v44 = vpop.eup %3600 }
0x15a5   :  { %v1674_v48 = vmul.f32 %v3601_v44, %v1669_v46 }
0x15a7   :  { %1675 = vst [vmem:[#allocation2 + $0xa] sm:$0x3] %v1674_v48  ;;  %2929 = vmatmul.mubr.f32.vlgmr.msra.gmra.mrb[16].mxu1 %v1674_v48 }
0x15a8   :  { %2998 = vmatprep.mubr.f32.mxu1 %v1858_v49  ;;  %3447 = vmatpush3.bf16.msra.mxu1 %v3444_v16 }
0x15a9   :  { %3449 = vmatprep.subr.bf16.mxu1 %v3448_v21 }
0x15ac   :  { %3451 = vmatpush3.bf16.msra.mxu1 %v3448_v21 }
0x15ad   :  { %3453 = vmatprep.subr.bf16.mxu1 %v3452_v29 }
0x15b0   :  { %3455 = vmatpush3.bf16.msra.mxu1 %v3452_v29 }
0x15b1   :  { %3457 = vmatprep.subr.bf16.mxu1 %v3456_v31 }
0x15b4   :  { %3459 = vmatpush3.bf16.msra.mxu1 %v3456_v31 }
0x15b5   :  { %3461 = vmatprep.subr.bf16.mxu1 %v3460_v30 }
0x15b8   :  { %3463 = vmatpush3.bf16.msra.mxu1 %v3460_v30 }
0x15b9   :  { %3465 = vmatprep.subr.bf16.mxu1 %v3464_v34 }
0x15bc   :  { %3467 = vmatpush3.bf16.msra.mxu1 %v3464_v34 }
0x15bd   :  { %3469 = vmatprep.subr.bf16.mxu1 %v3468_v1 }
0x15c0   :  { %3471 = vmatpush3.bf16.msra.mxu1 %v3468_v1 }
0x15c1   :  { %3473 = vmatprep.subr.bf16.mxu1 %v3472_v19 }
0x15c4   :  { %3475 = vmatpush3.bf16.msra.mxu1 %v3472_v19 }
0x167a   :  { %v1743_v54 = vpop.f32.mrb[16].mxu1 }
0x167b   :  { %v1747_v55 = vadd.f32 %v1743_v54, %v1676_v51  ;;  %v2930_v57 = vpop.f32.mrb[17].mxu1 }
0x167d   :  { %v1998_v58 = vmul.f32 -1.442695, %v1747_v55  ;;  %3602 = vtanh.f32 %v1747_v55 }
0x167f   :  { %3604 = vpow2.f32 %v1998_v58 }
0x1687   :  { %v3603_v59 = vpop.eup %3602 }
0x1688   :  { %1757 = vrot.lane.b32.xlu1 %v3603_v59, %s3770_s26 }
0x1689   :  { %v3605_v60 = vpop.eup %3604 }
0x168a   :  { %v1751_v61 = vadd.f32 1.0, %v3605_v60 }
0x168c   :  { %3606 = vrcp.f32 %v1751_v61 }
0x1696   :  { %v3607_v63 = vpop.eup %3606 }
0x1697   :  { %1755 = vrot.lane.b32.xlu0 %v3607_v63, %s3769_s25 }
0x169b   :  { %1759 = vrot.lane.b32.xlu0 %v3607_v63, %s3768_s24 }
0x16fa   :  { %v1758_v2 = vpop.permute.xlu1 %1757 }
0x16fb   :  { %v1762_v3 = vmul.f32 %v3607_v63, %v1758_v2 }
0x1709   :  { %v1756_v56 = vpop.permute.xlu0 %1755 }
0x170a   :  { %v1761_v4 = vmul.f32 %v1756_v56, %v1672_v42  ;;  %v2000_v42 = vld [vmem:[%s4329_s7] ss:$0 sm:$0xff] }
0x170c   :  { %v4297_v5 = vadd.f32 %v1762_v3, %v1761_v4 }
0x170d   :  { %v1760_v7 = vpop.permute.xlu0 %1759 }
0x170e   :  { %3608 = vtanh.f32 %v4297_v5 }
0x1718   :  { %v3609_v6 = vpop.eup %3608 }
0x1719   :  { %v1765_v8 = vmul.f32 %v3609_v6, %v1760_v7 }
0x171b   :  { %1766 = vst [vmem:[#allocation2 + $0xc] sm:$0x3] %v1765_v8  ;;  %2964 = vmatmul.mubr.f32.vlgmr.msra.gmra.mrb[18].mxu0 %v1765_v8 }
0x17ee   :  { %v1834_v10 = vpop.f32.mrb[18].mxu0 }
0x17ef   :  { %v1838_v11 = vadd.f32 %v1834_v10, %v1767_v9  ;;  %v2965_v62 = vpop.f32.mrb[19].mxu0 }
0x17f1   :  { %v1999_v20 = vmul.f32 -1.442695, %v1838_v11  ;;  %3610 = vtanh.f32 %v1838_v11 }
0x17f3   :  { %3612 = vpow2.f32 %v1999_v20 }
0x17fb   :  { %v3611_v22 = vpop.eup %3610 }
0x17fc   :  { %1848 = vrot.lane.b32.xlu0 %v3611_v22, %s3770_s26 }
0x17fd   :  { %v3613_v23 = vpop.eup %3612 }
0x17fe   :  { %v1842_v26 = vadd.f32 1.0, %v3613_v23 }
0x1800   :  { %3614 = vrcp.f32 %v1842_v26 }
0x180a   :  { %v3615_v47 = vpop.eup %3614 }
0x180b   :  { %1846 = vrot.lane.b32.xlu1 %v3615_v47, %s3769_s25 }
0x180f   :  { %1850 = vrot.lane.b32.xlu1 %v3615_v47, %s3768_s24 }
0x186e   :  { %v1849_v53 = vpop.permute.xlu0 %1848 }
0x186f   :  { %v1853_v38 = vmul.f32 %v3615_v47, %v1849_v53 }
0x187d   :  { %v1847_v39 = vpop.permute.xlu1 %1846 }
0x187e   :  { %v1852_v45 = vmul.f32 %v1847_v39, %v4297_v5 }
0x1880   :  { %v1854_v40 = vadd.f32 %v1853_v38, %v1852_v45 }
0x1881   :  { %v1851_v50 = vpop.permute.xlu1 %1850 }
0x1882   :  { %3616 = vtanh.f32 %v1854_v40 }
0x188c   :  { %v3617_v0 = vpop.eup %3616 }
0x188d   :  { %v1856_v52 = vmul.f32 %v3617_v0, %v1851_v50 }
0x188f   :  { %1857 = vst [vmem:[#allocation2 + $0xe] sm:$0x3] %v1856_v52 }
0x1896   :  { %v1859_v41 = vld [vmem:[#allocation2 + $0x8] sm:$0xff] }
0x1897   :  { %2999 = vmatmul.mubr.f32.vlgmr.msra.gmra.mrb[18].mxu1 %v1859_v41 }
0x196a   :  { %v3000_v44 = vpop.f32.mrb[18].mxu1 }
0x196b   :  { %v1955_v46 = vadd.f32 %v3000_v44, %v2000_v42  ;;  %v1949_v48 = vpop.f32.mrb[19].mxu1 }
0x196c   :  { %v1950_v49 = vadd.f32 %v2000_v42, %v1949_v48 }
0x196d   :  { %1959 = vst [vmem:[#allocation13 + $0x8] sm:$0xff] %v1955_v46 }
0x196e   :  { %1958 = vst [vmem:[#allocation13] sm:$0xff] %v1950_v49 }
0x196f   :  { %3739 = shalt.err (!%p3736_p2)
}
0x1970   :  { %s3740_s7 = scalar_lea.hbm %s4330_s8, 256 }
0x1971   :  { %p3741_p3 = scmp.ne.s32.totalorder %s4330_s8, %s3740_s7  ;;  %p3744_p4 = scmp.lt.u32.totalorder %s3740_s7, %s4330_s8 }
0x1973   :  { %p3746_p5 = pnand %p3744_p4, %p3741_p3 }
0x1975   :  { %3749 = shalt.err (!%p3746_p5)
}
0x1976   :  { %1971 = dma.vmem_to_hbm [thread:$0]  %s1966_s28, 256, %s4330_s8, [#allocation6], %s3759_s15, %s3759_s15, %s3760_s16  }
0x1977   :  { %3756 = dma.done.wait [#allocation6], 256  }
0x1978   :  { %3757 = vsyncadd [#allocation6], 4294967040 }
0x1979   :  { %1975 = vsyncpa [#allocation5], 1 }
0x197a   :  { %1976 = vsyncpa [#allocation8], 1 }
0x197b   :  { %1977 = vsyncpa [#allocation11], 1 }
0x197c   :  { %1978 = vsyncpa [#allocation6], 1 }

</bundles_post_ra>
